<compile_context>
chip_gen: v7x
topology: tpu7x:2x2x1
jax: 0.10.0
libtpu: 0.0.40
codegen_flags: <defaults>
</compile_context>

<pallas_src>
import functools
from typing import NamedTuple

import jax
import jax.numpy as jnp
import numpy as np
from jax.experimental import pallas as pl
from jax.experimental.pallas import tpu as pltpu

LANE = 128


def _round_up(x, m):
    return (x + m - 1) // m * m


class EasterParams(NamedTuple):
    """BN-folded, channel-padded, packed parameters (see fold_and_pack)."""
    w12: jax.Array   # (2, cin_p, cout_p)       folded conv1 / conv2 weights
    w3: jax.Array    # (K, cin_p, cout_p)       folded conv3 weights
    w45: jax.Array   # (2, K, cout_p, cout_p)   folded conv4 / conv5 weights
    vecs: jax.Array  # (10, cout_p) float32     per-channel shift/tail/bias rows
    gw1: jax.Array   # (cout_p, h_p)            GlobalContext linear1 weight
    gw2: jax.Array   # (h_p, cout_p)            GlobalContext linear2 weight


# row indices inside `vecs`
_SH1, _SH2, _SH3, _T3, _SH4, _T4, _SH5, _T5, _GB2, _GB1 = range(10)


class _Cfg(NamedTuple):
    kernel_size: int
    stride: int
    length: int
    l_out: int
    tile_b: int
    cin_p: int
    cout_p: int
    h_p: int
    pool_len: int


# ---------------------------------------------------------------------------
# Pallas kernel (one batch tile per grid step)
# ---------------------------------------------------------------------------
def _easter_kernel(cfg: _Cfg, old_ref, data_ref, w12_ref, w3_ref, w45_ref,
                   vecs_ref, gw1_ref, gw2_ref, out_data_ref, out_old_ref,
                   buf3, buf4):
    K, stride, L, l_out = cfg.kernel_size, cfg.stride, cfg.length, cfg.l_out
    TB, cp, hp, pool_len = cfg.tile_b, cfg.cout_p, cfg.h_p, cfg.pool_len
    f32 = jnp.float32
    cd = w12_ref.dtype                      # MXU compute dtype (bf16 here)

    def vec(row, width=cp):
        # per-channel f32 vector shaped (1, 1, width) for broadcasting
        return vecs_ref[row:row + 1, :width].reshape(1, 1, width)

    def mm(x, w):
        # (TB, S, Ci) @ (Ci, Co) -> (TB, S, Co) with f32 accumulation on MXU
        tb, s, ci = x.shape
        y = jnp.dot(x.reshape(tb * s, ci), w, preferred_element_type=f32)
        return y.reshape(tb, s, w.shape[1])

    # ---- residual branch: old = bn1(conv1(old)) + bn2(conv2(data)) --------
    old_new = (mm(old_ref[...], w12_ref[0]) + vec(_SH1)) \
        + (mm(data_ref[...], w12_ref[1]) + vec(_SH2))
    out_old_ref[...] = old_new.astype(out_old_ref.dtype)

    # ---- main branch: conv -> (zero-pad) -> folded-BN (-> relu), 3 stages --
    span = stride * (l_out - 1) + 1

    def conv_taps(src_ref, tap_w):
        # sum_j src[:, j : j + span : stride, :] @ w[j]   (f32 accumulator)
        acc = None
        for j in range(K):
            if stride == 1:
                xj = src_ref[:, j:j + l_out, :]            # static ref slice
            else:
                # TODO(synk): strided sublane ref windows; falls back to
                # slicing the loaded value (may relayout). Demo uses stride=1.
                xj = jax.lax.slice(src_ref[...], (0, j, 0),
                                   (TB, j + span, src_ref.shape[2]),
                                   (1, stride, 1))
            t = mm(xj, tap_w(j))
            acc = t if acc is None else acc + t
        return acc

    def store_stage(buf, valid, tail_row):
        buf[:, :l_out, :] = valid.astype(buf.dtype)
        if l_out < L:  # padded tail == BN shift (post-relu for stages 3/4)
            buf[:, l_out:, :] = jnp.broadcast_to(
                vec(tail_row), (TB, L - l_out, cp)).astype(buf.dtype)

    # stage 3 (reads `data`) and stage 4 (reads buf3): relu, stored to scratch
    s3 = jnp.maximum(conv_taps(data_ref, lambda j: w3_ref[j]) + vec(_SH3), 0.0)
    store_stage(buf3, s3, _T3)
    s4 = jnp.maximum(conv_taps(buf3, lambda j: w45_ref[0, j]) + vec(_SH4), 0.0)
    store_stage(buf4, s4, _T4)
    # stage 5 (reads buf4): no relu; keep as (valid slab, constant tail) values
    d_valid = conv_taps(buf4, lambda j: w45_ref[1, j]) + vec(_SH5)
    tail5 = vec(_T5)

    # ---- GlobalContext: AvgPool1d(out_channels)+mean -> MLP -> sigmoid gate -
    n_valid = min(pool_len, l_out)
    psum = jnp.sum(d_valid[:, :n_valid, :], axis=1)                  # (TB, cp)
    if pool_len > l_out:
        psum = psum + (pool_len - l_out) * tail5.reshape(1, cp)
    pooled = psum * (1.0 / pool_len)

    gb1 = vecs_ref[_GB1:_GB1 + 1, :hp]
    hid = jnp.maximum(jnp.dot(pooled.astype(cd), gw1_ref[...],
                              preferred_element_type=f32) + gb1, 0.0)
    gb2 = vecs_ref[_GB2:_GB2 + 1, :]
    logits = jnp.dot(hid.astype(cd), gw2_ref[...],
                     preferred_element_type=f32) + gb2
    gate = (1.0 / (1.0 + jnp.exp(-logits)))[:, None, :]              # (TB,1,cp)

    # ---- output: relu(old_new + gate * data)   (dropout = eval identity) ---
    out_data_ref[:, :l_out, :] = jnp.maximum(
        old_new[:, :l_out, :] + d_valid * gate, 0.0).astype(out_data_ref.dtype)
    if l_out < L:
        out_data_ref[:, l_out:, :] = jnp.maximum(
            old_new[:, l_out:, :] + tail5 * gate, 0.0).astype(out_data_ref.dtype)


# ---------------------------------------------------------------------------
# pallas_call wrapper (channels-last, lane-padded layout)
# ---------------------------------------------------------------------------
def easter_unit_nlc(old_p, data_p, params: EasterParams, *, kernel_size, stride,
                    out_channels, mean_pool=True, tile_b=1):
    """Core call. Inputs: (B, L, cin_p) channels-last, cin_p multiple of 128,
    in the MXU compute dtype. Returns lane-padded channels-last f32 outputs
    (B, L, cout_p). Call this directly (no transposes / slicing) when chaining
    EasterUnits."""
    B, L, cin_p = old_p.shape
    _, cin_p_w, cout_p = params.w12.shape
    assert data_p.shape == (B, L, cin_p)
    assert cin_p == cin_p_w, "input channel padding must match folded params"
    assert old_p.dtype == params.w12.dtype == data_p.dtype
    assert B % tile_b == 0
    assert L >= out_channels, "AvgPool1d(kernel=out_channels) needs L >= C_out"

    K = kernel_size
    h_p = params.gw1.shape[1]
    nv = params.vecs.shape[0]
    l_out = (L - K) // stride + 1
    pool_len = (L // out_channels) * out_channels if mean_pool else out_channels
    cfg = _Cfg(K, stride, L, l_out, tile_b, cin_p, cout_p, h_p, pool_len)

    # explicit VMEM budget (re-derived against the v7x 64 MiB physical ceiling)
    cd_bytes = jnp.dtype(old_p.dtype).itemsize
    weight_bytes = sum(a.size * a.dtype.itemsize for a in params)
    act_bytes = 2 * (2 * tile_b * L * cin_p * cd_bytes)    # 2 inputs, 2 buffers
    out_bytes = 2 * (2 * tile_b * L * cout_p * 4)          # 2 f32 outs, 2 buffers
    scratch_bytes = 2 * tile_b * L * cout_p * cd_bytes
    vmem_limit = int(min(64 << 20, max(32 << 20, 2 * (
        weight_bytes + act_bytes + out_bytes + scratch_bytes))))

    batch_in = pl.BlockSpec((tile_b, L, cin_p), lambda b: (b, 0, 0))
    batch_out = pl.BlockSpec((tile_b, L, cout_p), lambda b: (b, 0, 0))
    grid_spec = pltpu.PrefetchScalarGridSpec(
        num_scalar_prefetch=0,
        grid=(B // tile_b,),
        in_specs=[
            batch_in,                                                 # old
            batch_in,                                                 # data
            # weights/vectors: constant block index -> stay VMEM-resident
            pl.BlockSpec((2, cin_p, cout_p), lambda b: (0, 0, 0)),    # w12
            pl.BlockSpec((K, cin_p, cout_p), lambda b: (0, 0, 0)),    # w3
            pl.BlockSpec((2, K, cout_p, cout_p), lambda b: (0, 0, 0, 0)),  # w45
            pl.BlockSpec((nv, cout_p), lambda b: (0, 0)),             # vecs
            pl.BlockSpec((cout_p, h_p), lambda b: (0, 0)),            # gw1
            pl.BlockSpec((h_p, cout_p), lambda b: (0, 0)),            # gw2
        ],
        out_specs=(batch_out, batch_out),
        scratch_shapes=[pltpu.VMEM((tile_b, L, cout_p), old_p.dtype),
                        pltpu.VMEM((tile_b, L, cout_p), old_p.dtype)],
    )
    return pl.pallas_call(
        functools.partial(_easter_kernel, cfg),
        out_shape=(jax.ShapeDtypeStruct((B, L, cout_p), jnp.float32),
                   jax.ShapeDtypeStruct((B, L, cout_p), jnp.float32)),
        grid_spec=grid_spec,
        compiler_params=pltpu.CompilerParams(
            dimension_semantics=("parallel",),   # batch tiles are independent
            vmem_limit_bytes=vmem_limit),
    )(old_p, data_p, params.w12, params.w3, params.w45, params.vecs,
      params.gw1, params.gw2)


@functools.partial(jax.jit, static_argnames=("kernel_size", "stride",
                                             "out_channels", "mean_pool",
                                             "compute_dtype", "tile_b"))
def easter_unit(old_ncl, data_ncl, params: EasterParams, *, kernel_size, stride,
                out_channels, mean_pool=True, compute_dtype=jnp.bfloat16,
                tile_b=1):
    """PyTorch-layout (B, C, L) convenience wrapper.

    # TODO(synk): when several EasterUnits are chained, keep the lane-padded
    # channels-last layout end-to-end (use easter_unit_nlc) instead of paying
    # an HBM transpose + pad/slice round trip per unit.
    """
    B, cin, L = old_ncl.shape
    cin_p = params.w12.shape[1]
    assert cin <= cin_p

    def to_nlc(x):
        x = jnp.transpose(x, (0, 2, 1)).astype(compute_dtype)
        return jnp.pad(x, ((0, 0), (0, 0), (0, cin_p - cin)))

    out_data_p, out_old_p = easter_unit_nlc(
        to_nlc(old_ncl), to_nlc(data_ncl), params,
        kernel_size=kernel_size, stride=stride, out_channels=out_channels,
        mean_pool=mean_pool, tile_b=tile_b)
    out_data = jnp.transpose(out_data_p[:, :, :out_channels], (0, 2, 1))
    out_old = jnp.transpose(out_old_p[:, :, :out_channels], (0, 2, 1))
    return out_data, out_old


# ---------------------------------------------------------------------------
# parameter generation / BN folding / packing
# ---------------------------------------------------------------------------
def init_raw_params(key, cin, cout, kernel_size):
    """Deterministic synthetic PyTorch-equivalent parameters (eval mode)."""
    keys = iter(jax.random.split(key, 40))

    def nrm(shape, scale=0.1):
        return scale * jax.random.normal(next(keys), shape, dtype=jnp.float32)

    def bn():
        g = 1.0 + nrm((cout,))
        beta = nrm((cout,))
        m = nrm((cout,))
        v = 1.0 + 0.5 * jax.random.uniform(next(keys), (cout,), dtype=jnp.float32)
        return (g, beta, m, v)

    w1, b1 = nrm((cin, cout)), nrm((cout,))
    w2, b2 = nrm((cin, cout)), nrm((cout,))
    w3, b3 = nrm((kernel_size, cin, cout)), nrm((cout,))
    w4, b4 = nrm((kernel_size, cout, cout)), nrm((cout,))
    w5, b5 = nrm((kernel_size, cout, cout)), nrm((cout,))
    gw1, gb1 = nrm((cout, cout // 8)), nrm((cout // 8,))
    gw2, gb2 = nrm((cout // 8, cout)), nrm((cout,))
    return (w1, b1, bn(), w2, b2, bn(), w3, b3, bn(), w4, b4, bn(),
            w5, b5, bn(), gw1, gb1, gw2, gb2)


def fold_and_pack(raw, *, in_channels, out_channels, kernel_size, eps=1e-5,
                  compute_dtype=jnp.bfloat16):
    """Fold inference BatchNorm into conv weights, pad channels to 128-lane
    multiples, and pack the small per-channel vectors into one array."""
    assert out_channels >= 8
    (w1, b1, bn1, w2, b2, bn2, w3, b3, bn3, w4, b4, bn4, w5, b5, bn5,
     gw1, gb1, gw2, gb2) = raw
    cin_p = _round_up(in_channels, LANE)
    cout_p = _round_up(out_channels, LANE)
    h_p = _round_up(out_channels // 8, LANE)

    def fold(w, b, bn):
        g, beta, m, v = bn
        s = g / jnp.sqrt(v + eps)
        shift = b * s + (beta - m * s)       # BN applied to conv(x)+bias
        tail = beta - m * s                  # BN applied to the zero padding
        return w * s, shift, tail

    def pad_last(a, n):
        return jnp.pad(a, [(0, 0)] * (a.ndim - 1) + [(0, n - a.shape[-1])])

    def pad2(a, r, c):
        return jnp.pad(a, [(0, 0)] * (a.ndim - 2)
                       + [(0, r - a.shape[-2]), (0, c - a.shape[-1])])

    w1f, sh1, _ = fold(w1, b1, bn1)
    w2f, sh2, _ = fold(w2, b2, bn2)
    w3f, sh3, t3 = fold(w3, b3, bn3)
    w4f, sh4, t4 = fold(w4, b4, bn4)
    w5f, sh5, t5 = fold(w5, b5, bn5)

    w12 = jnp.stack([pad2(w1f, cin_p, cout_p),
                     pad2(w2f, cin_p, cout_p)]).astype(compute_dtype)
    w3p = pad2(w3f, cin_p, cout_p).astype(compute_dtype)
    w45 = jnp.stack([pad2(w4f, cout_p, cout_p),
                     pad2(w5f, cout_p, cout_p)]).astype(compute_dtype)

    rows = [sh1, sh2, sh3, jnp.maximum(t3, 0.0), sh4, jnp.maximum(t4, 0.0),
            sh5, t5, gb2, gb1]
    vecs = jnp.concatenate([pad_last(r.reshape(1, -1), cout_p) for r in rows],
                           axis=0).astype(jnp.float32)
    gw1p = pad2(gw1, cout_p, h_p).astype(compute_dtype)
    gw2p = pad2(gw2, h_p, cout_p).astype(compute_dtype)
    return EasterParams(w12, w3p, w45, vecs, gw1p, gw2p)


# ---------------------------------------------------------------------------
# references for the self-check
# ---------------------------------------------------------------------------
def folded_reference(old_p, data_p, p: EasterParams, cfg: _Cfg):
    """Plain-XLA mirror of the kernel math (same folded params / bf16 casts)."""
    f32 = jnp.float32
    K, stride, L, l_out = cfg.kernel_size, cfg.stride, cfg.length, cfg.l_out
    cp, hp, pool_len = cfg.cout_p, cfg.h_p, cfg.pool_len
    cd = p.w12.dtype

    def mm(x, w):
        b, s, ci = x.shape
        return jnp.dot(x.reshape(b * s, ci), w,
                       preferred_element_type=f32).reshape(b, s, w.shape[1])

    def vec(i, width=cp):
        return p.vecs[i:i + 1, :width].reshape(1, 1, width)

    old_new = (mm(old_p, p.w12[0]) + vec(_SH1)) + (mm(data_p, p.w12[1]) + vec(_SH2))

    def conv_taps(x, taps):
        acc = None
        for j in range(K):
            xs = jax.lax.slice(x, (0, j, 0),
                               (x.shape[0], j + stride * (l_out - 1) + 1, x.shape[2]),
                               (1, stride, 1))
            t = mm(xs, taps[j])
            acc = t if acc is None else acc + t
        return acc

    def pad_full(valid_cd, tail_vec):
        b = valid_cd.shape[0]
        if l_out >= L:
            return valid_cd
        tail = jnp.broadcast_to(tail_vec, (b, L - l_out, cp)).astype(cd)
        return jnp.concatenate([valid_cd, tail], axis=1)

    s3 = pad_full(jnp.maximum(conv_taps(data_p, p.w3) + vec(_SH3), 0.0).astype(cd),
                  vec(_T3))
    s4 = pad_full(jnp.maximum(conv_taps(s3, p.w45[0]) + vec(_SH4), 0.0).astype(cd),
                  vec(_T4))
    d_valid = conv_taps(s4, p.w45[1]) + vec(_SH5)
    tail5 = vec(_T5)

    n_valid = min(pool_len, l_out)
    psum = jnp.sum(d_valid[:, :n_valid, :], axis=1)
    if pool_len > l_out:
        psum = psum + (pool_len - l_out) * tail5.reshape(1, cp)
    pooled = psum * (1.0 / pool_len)

    gb1 = p.vecs[_GB1:_GB1 + 1, :hp]
    hid = jnp.maximum(jnp.dot(pooled.astype(cd), p.gw1,
                              preferred_element_type=f32) + gb1, 0.0)
    gb2 = p.vecs[_GB2:_GB2 + 1, :]
    gate = (1.0 / (1.0 + jnp.exp(-(jnp.dot(hid.astype(cd), p.gw2,
                                           preferred_element_type=f32) + gb2))))
    gate = gate[:, None, :]

    out_valid = jnp.maximum(old_new[:, :l_out, :] + d_valid * gate, 0.0)
    if l_out < L:
        out_tail = jnp.maximum(old_new[:, l_out:, :] + tail5 * gate, 0.0)
        out = jnp.concatenate([out_valid, out_tail], axis=1)
    else:
        out = out_valid
    return out, old_new


def reference_forward(old_ncl, data_ncl, raw, kernel_size, stride,
                      mean_pool=True, eps=1e-5):
    """Independent f32 reference with the exact PyTorch op order (un-folded BN,
    conv bias, zero-pad then BN), un-padded channels, eval mode."""
    HI = jax.lax.Precision.HIGHEST
    old = jnp.transpose(old_ncl, (0, 2, 1)).astype(jnp.float32)
    data = jnp.transpose(data_ncl, (0, 2, 1)).astype(jnp.float32)
    (w1, b1, bn1, w2, b2, bn2, w3, b3, bn3, w4, b4, bn4, w5, b5, bn5,
     gw1, gb1, gw2, gb2) = raw
    B, L, _ = old.shape
    cout = w1.shape[1]

    def bn(x, p):
        g, beta, m, v = p
        return (x - m) * (g / jnp.sqrt(v + eps)) + beta

    def conv(x, w, b):
        K = w.shape[0]
        l_out = (x.shape[1] - K) // stride + 1
        acc = None
        for j in range(K):
            xs = jax.lax.slice(x, (0, j, 0),
                               (x.shape[0], j + stride * (l_out - 1) + 1, x.shape[2]),
                               (1, stride, 1))
            t = jnp.einsum("blc,cd->bld", xs, w[j], precision=HI)
            acc = t if acc is None else acc + t
        return acc + b

    def pad_to(x, lt):
        return jnp.pad(x, ((0, 0), (0, lt - x.shape[1]), (0, 0)))

    old_new = bn(jnp.einsum("blc,cd->bld", old, w1, precision=HI) + b1, bn1) \
        + bn(jnp.einsum("blc,cd->bld", data, w2, precision=HI) + b2, bn2)

    d = data
    for (w, b, p, act) in ((w3, b3, bn3, True), (w4, b4, bn4, True),
                           (w5, b5, bn5, False)):
        d = bn(pad_to(conv(d, w, b), L), p)
        if act:
            d = jnp.maximum(d, 0.0)          # dropout: eval-mode identity

    if mean_pool:
        pooled = jnp.mean(d[:, :(L // cout) * cout, :], axis=1)
    else:
        pooled = jnp.mean(d[:, :cout, :], axis=1)
    hid = jnp.maximum(jnp.dot(pooled, gw1, precision=HI) + gb1, 0.0)
    gate = jax.nn.sigmoid(jnp.dot(hid, gw2, precision=HI) + gb2)
    out = jnp.maximum(old_new + d * gate[:, None, :], 0.0)
    return jnp.transpose(out, (0, 2, 1)), jnp.transpose(old_new, (0, 2, 1))


# ---------------------------------------------------------------------------
# main
# ---------------------------------------------------------------------------
if __name__ == "__main__":
    B, Cin, Cout, L = 2, 8, 16, 32
    K, stride = 3, 1                      # dropout=0.2 in the module: eval identity
    compute_dtype = jnp.bfloat16          # bf16 MXU inputs, f32 accumulate/epilogue

    key = jax.random.PRNGKey(0)
    k_params, k_old, k_data = jax.random.split(key, 3)
    raw = init_raw_params(k_params, Cin, Cout, K)
    params = fold_and_pack(raw, in_channels=Cin, out_channels=Cout,
                           kernel_size=K, compute_dtype=compute_dtype)

    # PyTorch NCL-shaped inputs: (batch, channels, length)
    old = jax.random.normal(k_old, (B, Cin, L), dtype=jnp.float32)
    data = jax.random.normal(k_data, (B, Cin, L), dtype=jnp.float32)

    out_data, out_old = easter_unit(old, data, params, kernel_size=K,
                                    stride=stride, out_channels=Cout,
                                    mean_pool=True, compute_dtype=compute_dtype,
                                    tile_b=1)
    jax.block_until_ready((out_data, out_old))
    assert out_data.shape == (B, Cout, L) and out_old.shape == (B, Cout, L)

    # check 1 (tight): identical folded/padded bf16 math in plain XLA
    cin_p, cout_p = params.w12.shape[1], params.w12.shape[2]
    cfg = _Cfg(K, stride, L, (L - K) // stride + 1, 1, cin_p, cout_p,
               params.gw1.shape[1], (L // Cout) * Cout)

    def to_nlc(x):
        x = jnp.transpose(x, (0, 2, 1)).astype(compute_dtype)
        return jnp.pad(x, ((0, 0), (0, 0), (0, cin_p - Cin)))

    ref_d_p, ref_o_p = folded_reference(to_nlc(old), to_nlc(data), params, cfg)
    ref_d = jnp.transpose(ref_d_p[:, :, :Cout], (0, 2, 1))
    ref_o = jnp.transpose(ref_o_p[:, :, :Cout], (0, 2, 1))
    np.testing.assert_allclose(np.asarray(out_data), np.asarray(ref_d),
                               rtol=2e-3, atol=2e-3)
    np.testing.assert_allclose(np.asarray(out_old), np.asarray(ref_o),
                               rtol=2e-3, atol=2e-3)

    # check 2 (loose, bf16 tolerance): independent f32 reference, PyTorch op order
    gold_d, gold_o = reference_forward(old, data, raw, K, stride, mean_pool=True)
    np.testing.assert_allclose(np.asarray(out_data), np.asarray(gold_d),
                               rtol=5e-2, atol=5e-2)
    np.testing.assert_allclose(np.asarray(out_old), np.asarray(gold_o),
                               rtol=5e-2, atol=5e-2)

    print("KERNEL_OK")
</pallas_src>

<mosaic_0001>
module attributes {stable_mosaic.version = 11 : i64} {
  func.func @_easter_kernel(%arg0: i32, %arg1: memref<1x32x128xbf16, #tpu.memory_space<vmem>>, %arg2: memref<1x32x128xbf16, #tpu.memory_space<vmem>>, %arg3: memref<2x128x128xbf16, #tpu.memory_space<vmem>>, %arg4: memref<3x128x128xbf16, #tpu.memory_space<vmem>>, %arg5: memref<2x3x128x128xbf16, #tpu.memory_space<vmem>>, %arg6: memref<10x128xf32, #tpu.memory_space<vmem>>, %arg7: memref<128x128xbf16, #tpu.memory_space<vmem>>, %arg8: memref<128x128xbf16, #tpu.memory_space<vmem>>, %arg9: memref<1x32x128xf32, #tpu.memory_space<vmem>>, %arg10: memref<1x32x128xf32, #tpu.memory_space<vmem>>, %arg11: memref<1x32x128xbf16, #tpu.memory_space<vmem>>, %arg12: memref<1x32x128xbf16, #tpu.memory_space<vmem>>) attributes {dimension_semantics = [#tpu.dimension_semantics<parallel>], iteration_bounds = array<i64: 2>, scalar_prefetch = 0 : i64, scratch_operands = 2 : i64, tpu.core_type = #tpu.core_type<tc>, window_params = [{transform_indices = @transform_0, window_bounds = array<i64: 1, 32, 128>}, {transform_indices = @transform_1, window_bounds = array<i64: 1, 32, 128>}, {pipeline_mode = #tpu.pipeline_mode<synchronous>, transform_indices = @transform_2, window_bounds = array<i64: 2, 128, 128>}, {pipeline_mode = #tpu.pipeline_mode<synchronous>, transform_indices = @transform_3, window_bounds = array<i64: 3, 128, 128>}, {pipeline_mode = #tpu.pipeline_mode<synchronous>, transform_indices = @transform_4, window_bounds = array<i64: 2, 3, 128, 128>}, {pipeline_mode = #tpu.pipeline_mode<synchronous>, transform_indices = @transform_5, window_bounds = array<i64: 10, 128>}, {pipeline_mode = #tpu.pipeline_mode<synchronous>, transform_indices = @transform_6, window_bounds = array<i64: 128, 128>}, {pipeline_mode = #tpu.pipeline_mode<synchronous>, transform_indices = @transform_7, window_bounds = array<i64: 128, 128>}, {transform_indices = @transform_8, window_bounds = array<i64: 1, 32, 128>}, {transform_indices = @transform_9, window_bounds = array<i64: 1, 32, 128>}]} {
    %c0 = arith.constant 0 : index
    %c0_0 = arith.constant 0 : index
    %c0_1 = arith.constant 0 : index
    %0 = vector.load %arg1[%c0, %c0_0, %c0_1] : memref<1x32x128xbf16, #tpu.memory_space<vmem>>, vector<1x32x128xbf16>
    %c0_2 = arith.constant 0 : index
    %c0_3 = arith.constant 0 : index
    %c0_4 = arith.constant 0 : index
    %1 = vector.load %arg3[%c0_2, %c0_3, %c0_4] : memref<2x128x128xbf16, #tpu.memory_space<vmem>>, vector<1x128x128xbf16>
    %2 = vector.shape_cast %1 : vector<1x128x128xbf16> to vector<128x128xbf16>
    %3 = vector.shape_cast %0 : vector<1x32x128xbf16> to vector<32x128xbf16>
    %cst = arith.constant dense<0.000000e+00> : vector<32x128xf32>
    %4 = tpu.matmul %3, %2, %cst {dimension_numbers = #tpu.dot_dimension_numbers<[1], [0], [0], [1], [0, 0, 1, 1], [], []>} : vector<32x128xbf16>, vector<128x128xbf16>, vector<32x128xf32> -> vector<32x128xf32>
    %5 = vector.shape_cast %4 : vector<32x128xf32> to vector<1x32x128xf32>
    %c0_5 = arith.constant 0 : index
    %c0_6 = arith.constant 0 : index
    %6 = vector.load %arg6[%c0_5, %c0_6] : memref<10x128xf32, #tpu.memory_space<vmem>>, vector<1x128xf32>
    %7 = vector.shape_cast %6 : vector<1x128xf32> to vector<1x1x128xf32>
    %8 = vector.broadcast %7 : vector<1x1x128xf32> to vector<1x32x128xf32>
    %9 = arith.addf %5, %8 : vector<1x32x128xf32>
    %c0_7 = arith.constant 0 : index
    %c0_8 = arith.constant 0 : index
    %c0_9 = arith.constant 0 : index
    %10 = vector.load %arg2[%c0_7, %c0_8, %c0_9] : memref<1x32x128xbf16, #tpu.memory_space<vmem>>, vector<1x32x128xbf16>
    %c1 = arith.constant 1 : index
    %c0_10 = arith.constant 0 : index
    %c0_11 = arith.constant 0 : index
    %11 = vector.load %arg3[%c1, %c0_10, %c0_11] : memref<2x128x128xbf16, #tpu.memory_space<vmem>>, vector<1x128x128xbf16>
    %12 = vector.shape_cast %11 : vector<1x128x128xbf16> to vector<128x128xbf16>
    %13 = vector.shape_cast %10 : vector<1x32x128xbf16> to vector<32x128xbf16>
    %cst_12 = arith.constant dense<0.000000e+00> : vector<32x128xf32>
    %14 = tpu.matmul %13, %12, %cst_12 {dimension_numbers = #tpu.dot_dimension_numbers<[1], [0], [0], [1], [0, 0, 1, 1], [], []>} : vector<32x128xbf16>, vector<128x128xbf16>, vector<32x128xf32> -> vector<32x128xf32>
    %15 = vector.shape_cast %14 : vector<32x128xf32> to vector<1x32x128xf32>
    %c1_13 = arith.constant 1 : index
    %c0_14 = arith.constant 0 : index
    %16 = vector.load %arg6[%c1_13, %c0_14] : memref<10x128xf32, #tpu.memory_space<vmem>>, vector<1x128xf32>
    %17 = vector.shape_cast %16 : vector<1x128xf32> to vector<1x1x128xf32>
    %18 = vector.broadcast %17 : vector<1x1x128xf32> to vector<1x32x128xf32>
    %19 = arith.addf %15, %18 : vector<1x32x128xf32>
    %20 = arith.addf %9, %19 : vector<1x32x128xf32>
    %c0_15 = arith.constant 0 : index
    %c0_16 = arith.constant 0 : index
    %c0_17 = arith.constant 0 : index
    %21 = vector.load %arg10[%c0_15, %c0_16, %c0_17] : memref<1x32x128xf32, #tpu.memory_space<vmem>>, vector<1x32x128xf32>
    tpu.vector_store %arg10[%c0_15, %c0_16, %c0_17], %20 {strides = array<i32>} : memref<1x32x128xf32, #tpu.memory_space<vmem>>, vector<1x32x128xf32>,
    %c0_18 = arith.constant 0 : index
    %c0_19 = arith.constant 0 : index
    %c0_20 = arith.constant 0 : index
    %22 = vector.load %arg2[%c0_18, %c0_19, %c0_20] : memref<1x32x128xbf16, #tpu.memory_space<vmem>>, vector<1x30x128xbf16>
    %c0_21 = arith.constant 0 : index
    %c0_22 = arith.constant 0 : index
    %c0_23 = arith.constant 0 : index
    %23 = vector.load %arg4[%c0_21, %c0_22, %c0_23] : memref<3x128x128xbf16, #tpu.memory_space<vmem>>, vector<1x128x128xbf16>
    %24 = vector.shape_cast %23 : vector<1x128x128xbf16> to vector<128x128xbf16>
    %25 = vector.shape_cast %22 : vector<1x30x128xbf16> to vector<30x128xbf16>
    %cst_24 = arith.constant dense<0.000000e+00> : vector<30x128xf32>
    %26 = tpu.matmul %25, %24, %cst_24 {dimension_numbers = #tpu.dot_dimension_numbers<[1], [0], [0], [1], [0, 0, 1, 1], [], []>} : vector<30x128xbf16>, vector<128x128xbf16>, vector<30x128xf32> -> vector<30x128xf32>
    %27 = vector.shape_cast %26 : vector<30x128xf32> to vector<1x30x128xf32>
    %c0_25 = arith.constant 0 : index
    %c1_26 = arith.constant 1 : index
    %c0_27 = arith.constant 0 : index
    %28 = vector.load %arg2[%c0_25, %c1_26, %c0_27] : memref<1x32x128xbf16, #tpu.memory_space<vmem>>, vector<1x30x128xbf16>
    %c1_28 = arith.constant 1 : index
    %c0_29 = arith.constant 0 : index
    %c0_30 = arith.constant 0 : index
    %29 = vector.load %arg4[%c1_28, %c0_29, %c0_30] : memref<3x128x128xbf16, #tpu.memory_space<vmem>>, vector<1x128x128xbf16>
    %30 = vector.shape_cast %29 : vector<1x128x128xbf16> to vector<128x128xbf16>
    %31 = vector.shape_cast %28 : vector<1x30x128xbf16> to vector<30x128xbf16>
    %cst_31 = arith.constant dense<0.000000e+00> : vector<30x128xf32>
    %32 = tpu.matmul %31, %30, %cst_31 {dimension_numbers = #tpu.dot_dimension_numbers<[1], [0], [0], [1], [0, 0, 1, 1], [], []>} : vector<30x128xbf16>, vector<128x128xbf16>, vector<30x128xf32> -> vector<30x128xf32>
    %33 = vector.shape_cast %32 : vector<30x128xf32> to vector<1x30x128xf32>
    %34 = arith.addf %27, %33 : vector<1x30x128xf32>
    %c0_32 = arith.constant 0 : index
    %c2 = arith.constant 2 : index
    %c0_33 = arith.constant 0 : index
    %35 = vector.load %arg2[%c0_32, %c2, %c0_33] : memref<1x32x128xbf16, #tpu.memory_space<vmem>>, vector<1x30x128xbf16>
    %c2_34 = arith.constant 2 : index
    %c0_35 = arith.constant 0 : index
    %c0_36 = arith.constant 0 : index
    %36 = vector.load %arg4[%c2_34, %c0_35, %c0_36] : memref<3x128x128xbf16, #tpu.memory_space<vmem>>, vector<1x128x128xbf16>
    %37 = vector.shape_cast %36 : vector<1x128x128xbf16> to vector<128x128xbf16>
    %38 = vector.shape_cast %35 : vector<1x30x128xbf16> to vector<30x128xbf16>
    %cst_37 = arith.constant dense<0.000000e+00> : vector<30x128xf32>
    %39 = tpu.matmul %38, %37, %cst_37 {dimension_numbers = #tpu.dot_dimension_numbers<[1], [0], [0], [1], [0, 0, 1, 1], [], []>} : vector<30x128xbf16>, vector<128x128xbf16>, vector<30x128xf32> -> vector<30x128xf32>
    %40 = vector.shape_cast %39 : vector<30x128xf32> to vector<1x30x128xf32>
    %41 = arith.addf %34, %40 : vector<1x30x128xf32>
    %c2_38 = arith.constant 2 : index
    %c0_39 = arith.constant 0 : index
    %42 = vector.load %arg6[%c2_38, %c0_39] : memref<10x128xf32, #tpu.memory_space<vmem>>, vector<1x128xf32>
    %43 = vector.shape_cast %42 : vector<1x128xf32> to vector<1x1x128xf32>
    %44 = vector.broadcast %43 : vector<1x1x128xf32> to vector<1x30x128xf32>
    %45 = arith.addf %41, %44 : vector<1x30x128xf32>
    %cst_40 = arith.constant 0.000000e+00 : f32
    %46 = vector.broadcast %cst_40 : f32 to vector<1x30x128xf32>
    %47 = arith.maximumf %45, %46 : vector<1x30x128xf32>
    %48 = arith.truncf %47 : vector<1x30x128xf32> to vector<1x30x128xbf16>
    %c0_41 = arith.constant 0 : index
    %c0_42 = arith.constant 0 : index
    %c0_43 = arith.constant 0 : index
    %49 = vector.load %arg11[%c0_41, %c0_42, %c0_43] : memref<1x32x128xbf16, #tpu.memory_space<vmem>>, vector<1x30x128xbf16>
    tpu.vector_store %arg11[%c0_41, %c0_42, %c0_43], %48 {strides = array<i32>} : memref<1x32x128xbf16, #tpu.memory_space<vmem>>, vector<1x30x128xbf16>,
    %c3 = arith.constant 3 : index
    %c0_44 = arith.constant 0 : index
    %50 = vector.load %arg6[%c3, %c0_44] : memref<10x128xf32, #tpu.memory_space<vmem>>, vector<1x128xf32>
    %51 = vector.shape_cast %50 : vector<1x128xf32> to vector<1x1x128xf32>
    %52 = vector.shape_cast %51 : vector<1x1x128xf32> to vector<1x1x128xf32>
    %53 = vector.broadcast %52 : vector<1x1x128xf32> to vector<1x2x128xf32>
    %54 = arith.truncf %53 : vector<1x2x128xf32> to vector<1x2x128xbf16>
    %c0_45 = arith.constant 0 : index
    %c30 = arith.constant 30 : index
    %c0_46 = arith.constant 0 : index
    %55 = vector.load %arg11[%c0_45, %c30, %c0_46] : memref<1x32x128xbf16, #tpu.memory_space<vmem>>, vector<1x2x128xbf16>
    tpu.vector_store %arg11[%c0_45, %c30, %c0_46], %54 {strides = array<i32>} : memref<1x32x128xbf16, #tpu.memory_space<vmem>>, vector<1x2x128xbf16>,
    %c0_47 = arith.constant 0 : index
    %c0_48 = arith.constant 0 : index
    %c0_49 = arith.constant 0 : index
    %56 = vector.load %arg11[%c0_47, %c0_48, %c0_49] : memref<1x32x128xbf16, #tpu.memory_space<vmem>>, vector<1x30x128xbf16>
    %c0_50 = arith.constant 0 : index
    %c0_51 = arith.constant 0 : index
    %c0_52 = arith.constant 0 : index
    %c0_53 = arith.constant 0 : index
    %57 = vector.load %arg5[%c0_50, %c0_51, %c0_52, %c0_53] : memref<2x3x128x128xbf16, #tpu.memory_space<vmem>>, vector<1x1x128x128xbf16>
    %58 = vector.shape_cast %57 : vector<1x1x128x128xbf16> to vector<128x128xbf16>
    %59 = vector.shape_cast %56 : vector<1x30x128xbf16> to vector<30x128xbf16>
    %cst_54 = arith.constant dense<0.000000e+00> : vector<30x128xf32>
    %60 = tpu.matmul %59, %58, %cst_54 {dimension_numbers = #tpu.dot_dimension_numbers<[1], [0], [0], [1], [0, 0, 1, 1], [], []>} : vector<30x128xbf16>, vector<128x128xbf16>, vector<30x128xf32> -> vector<30x128xf32>
    %61 = vector.shape_cast %60 : vector<30x128xf32> to vector<1x30x128xf32>
    %c0_55 = arith.constant 0 : index
    %c1_56 = arith.constant 1 : index
    %c0_57 = arith.constant 0 : index
    %62 = vector.load %arg11[%c0_55, %c1_56, %c0_57] : memref<1x32x128xbf16, #tpu.memory_space<vmem>>, vector<1x30x128xbf16>
    %c0_58 = arith.constant 0 : index
    %c1_59 = arith.constant 1 : index
    %c0_60 = arith.constant 0 : index
    %c0_61 = arith.constant 0 : index
    %63 = vector.load %arg5[%c0_58, %c1_59, %c0_60, %c0_61] : memref<2x3x128x128xbf16, #tpu.memory_space<vmem>>, vector<1x1x128x128xbf16>
    %64 = vector.shape_cast %63 : vector<1x1x128x128xbf16> to vector<128x128xbf16>
    %65 = vector.shape_cast %62 : vector<1x30x128xbf16> to vector<30x128xbf16>
    %cst_62 = arith.constant dense<0.000000e+00> : vector<30x128xf32>
    %66 = tpu.matmul %65, %64, %cst_62 {dimension_numbers = #tpu.dot_dimension_numbers<[1], [0], [0], [1], [0, 0, 1, 1], [], []>} : vector<30x128xbf16>, vector<128x128xbf16>, vector<30x128xf32> -> vector<30x128xf32>
    %67 = vector.shape_cast %66 : vector<30x128xf32> to vector<1x30x128xf32>
    %68 = arith.addf %61, %67 : vector<1x30x128xf32>
    %c0_63 = arith.constant 0 : index
    %c2_64 = arith.constant 2 : index
    %c0_65 = arith.constant 0 : index
    %69 = vector.load %arg11[%c0_63, %c2_64, %c0_65] : memref<1x32x128xbf16, #tpu.memory_space<vmem>>, vector<1x30x128xbf16>
    %c0_66 = arith.constant 0 : index
    %c2_67 = arith.constant 2 : index
    %c0_68 = arith.constant 0 : index
    %c0_69 = arith.constant 0 : index
    %70 = vector.load %arg5[%c0_66, %c2_67, %c0_68, %c0_69] : memref<2x3x128x128xbf16, #tpu.memory_space<vmem>>, vector<1x1x128x128xbf16>
    %71 = vector.shape_cast %70 : vector<1x1x128x128xbf16> to vector<128x128xbf16>
    %72 = vector.shape_cast %69 : vector<1x30x128xbf16> to vector<30x128xbf16>
    %cst_70 = arith.constant dense<0.000000e+00> : vector<30x128xf32>
    %73 = tpu.matmul %72, %71, %cst_70 {dimension_numbers = #tpu.dot_dimension_numbers<[1], [0], [0], [1], [0, 0, 1, 1], [], []>} : vector<30x128xbf16>, vector<128x128xbf16>, vector<30x128xf32> -> vector<30x128xf32>
    %74 = vector.shape_cast %73 : vector<30x128xf32> to vector<1x30x128xf32>
    %75 = arith.addf %68, %74 : vector<1x30x128xf32>
    %c4 = arith.constant 4 : index
    %c0_71 = arith.constant 0 : index
    %76 = vector.load %arg6[%c4, %c0_71] : memref<10x128xf32, #tpu.memory_space<vmem>>, vector<1x128xf32>
    %77 = vector.shape_cast %76 : vector<1x128xf32> to vector<1x1x128xf32>
    %78 = vector.broadcast %77 : vector<1x1x128xf32> to vector<1x30x128xf32>
    %79 = arith.addf %75, %78 : vector<1x30x128xf32>
    %cst_72 = arith.constant 0.000000e+00 : f32
    %80 = vector.broadcast %cst_72 : f32 to vector<1x30x128xf32>
    %81 = arith.maximumf %79, %80 : vector<1x30x128xf32>
    %82 = arith.truncf %81 : vector<1x30x128xf32> to vector<1x30x128xbf16>
    %c0_73 = arith.constant 0 : index
    %c0_74 = arith.constant 0 : index
    %c0_75 = arith.constant 0 : index
    %83 = vector.load %arg12[%c0_73, %c0_74, %c0_75] : memref<1x32x128xbf16, #tpu.memory_space<vmem>>, vector<1x30x128xbf16>
    tpu.vector_store %arg12[%c0_73, %c0_74, %c0_75], %82 {strides = array<i32>} : memref<1x32x128xbf16, #tpu.memory_space<vmem>>, vector<1x30x128xbf16>,
    %c5 = arith.constant 5 : index
    %c0_76 = arith.constant 0 : index
    %84 = vector.load %arg6[%c5, %c0_76] : memref<10x128xf32, #tpu.memory_space<vmem>>, vector<1x128xf32>
    %85 = vector.shape_cast %84 : vector<1x128xf32> to vector<1x1x128xf32>
    %86 = vector.shape_cast %85 : vector<1x1x128xf32> to vector<1x1x128xf32>
    %87 = vector.broadcast %86 : vector<1x1x128xf32> to vector<1x2x128xf32>
    %88 = arith.truncf %87 : vector<1x2x128xf32> to vector<1x2x128xbf16>
    %c0_77 = arith.constant 0 : index
    %c30_78 = arith.constant 30 : index
    %c0_79 = arith.constant 0 : index
    %89 = vector.load %arg12[%c0_77, %c30_78, %c0_79] : memref<1x32x128xbf16, #tpu.memory_space<vmem>>, vector<1x2x128xbf16>
    tpu.vector_store %arg12[%c0_77, %c30_78, %c0_79], %88 {strides = array<i32>} : memref<1x32x128xbf16, #tpu.memory_space<vmem>>, vector<1x2x128xbf16>,
    %c0_80 = arith.constant 0 : index
    %c0_81 = arith.constant 0 : index
    %c0_82 = arith.constant 0 : index
    %90 = vector.load %arg12[%c0_80, %c0_81, %c0_82] : memref<1x32x128xbf16, #tpu.memory_space<vmem>>, vector<1x30x128xbf16>
    %c1_83 = arith.constant 1 : index
    %c0_84 = arith.constant 0 : index
    %c0_85 = arith.constant 0 : index
    %c0_86 = arith.constant 0 : index
    %91 = vector.load %arg5[%c1_83, %c0_84, %c0_85, %c0_86] : memref<2x3x128x128xbf16, #tpu.memory_space<vmem>>, vector<1x1x128x128xbf16>
    %92 = vector.shape_cast %91 : vector<1x1x128x128xbf16> to vector<128x128xbf16>
    %93 = vector.shape_cast %90 : vector<1x30x128xbf16> to vector<30x128xbf16>
    %cst_87 = arith.constant dense<0.000000e+00> : vector<30x128xf32>
    %94 = tpu.matmul %93, %92, %cst_87 {dimension_numbers = #tpu.dot_dimension_numbers<[1], [0], [0], [1], [0, 0, 1, 1], [], []>} : vector<30x128xbf16>, vector<128x128xbf16>, vector<30x128xf32> -> vector<30x128xf32>
    %95 = vector.shape_cast %94 : vector<30x128xf32> to vector<1x30x128xf32>
    %c0_88 = arith.constant 0 : index
    %c1_89 = arith.constant 1 : index
    %c0_90 = arith.constant 0 : index
    %96 = vector.load %arg12[%c0_88, %c1_89, %c0_90] : memref<1x32x128xbf16, #tpu.memory_space<vmem>>, vector<1x30x128xbf16>
    %c1_91 = arith.constant 1 : index
    %c1_92 = arith.constant 1 : index
    %c0_93 = arith.constant 0 : index
    %c0_94 = arith.constant 0 : index
    %97 = vector.load %arg5[%c1_91, %c1_92, %c0_93, %c0_94] : memref<2x3x128x128xbf16, #tpu.memory_space<vmem>>, vector<1x1x128x128xbf16>
    %98 = vector.shape_cast %97 : vector<1x1x128x128xbf16> to vector<128x128xbf16>
    %99 = vector.shape_cast %96 : vector<1x30x128xbf16> to vector<30x128xbf16>
    %cst_95 = arith.constant dense<0.000000e+00> : vector<30x128xf32>
    %100 = tpu.matmul %99, %98, %cst_95 {dimension_numbers = #tpu.dot_dimension_numbers<[1], [0], [0], [1], [0, 0, 1, 1], [], []>} : vector<30x128xbf16>, vector<128x128xbf16>, vector<30x128xf32> -> vector<30x128xf32>
    %101 = vector.shape_cast %100 : vector<30x128xf32> to vector<1x30x128xf32>
    %102 = arith.addf %95, %101 : vector<1x30x128xf32>
    %c0_96 = arith.constant 0 : index
    %c2_97 = arith.constant 2 : index
    %c0_98 = arith.constant 0 : index
    %103 = vector.load %arg12[%c0_96, %c2_97, %c0_98] : memref<1x32x128xbf16, #tpu.memory_space<vmem>>, vector<1x30x128xbf16>
    %c1_99 = arith.constant 1 : index
    %c2_100 = arith.constant 2 : index
    %c0_101 = arith.constant 0 : index
    %c0_102 = arith.constant 0 : index
    %104 = vector.load %arg5[%c1_99, %c2_100, %c0_101, %c0_102] : memref<2x3x128x128xbf16, #tpu.memory_space<vmem>>, vector<1x1x128x128xbf16>
    %105 = vector.shape_cast %104 : vector<1x1x128x128xbf16> to vector<128x128xbf16>
    %106 = vector.shape_cast %103 : vector<1x30x128xbf16> to vector<30x128xbf16>
    %cst_103 = arith.constant dense<0.000000e+00> : vector<30x128xf32>
    %107 = tpu.matmul %106, %105, %cst_103 {dimension_numbers = #tpu.dot_dimension_numbers<[1], [0], [0], [1], [0, 0, 1, 1], [], []>} : vector<30x128xbf16>, vector<128x128xbf16>, vector<30x128xf32> -> vector<30x128xf32>
    %108 = vector.shape_cast %107 : vector<30x128xf32> to vector<1x30x128xf32>
    %109 = arith.addf %102, %108 : vector<1x30x128xf32>
    %c6 = arith.constant 6 : index
    %c0_104 = arith.constant 0 : index
    %110 = vector.load %arg6[%c6, %c0_104] : memref<10x128xf32, #tpu.memory_space<vmem>>, vector<1x128xf32>
    %111 = vector.shape_cast %110 : vector<1x128xf32> to vector<1x1x128xf32>
    %112 = vector.broadcast %111 : vector<1x1x128xf32> to vector<1x30x128xf32>
    %113 = arith.addf %109, %112 : vector<1x30x128xf32>
    %c7 = arith.constant 7 : index
    %c0_105 = arith.constant 0 : index
    %114 = vector.load %arg6[%c7, %c0_105] : memref<10x128xf32, #tpu.memory_space<vmem>>, vector<1x128xf32>
    %115 = vector.shape_cast %114 : vector<1x128xf32> to vector<1x1x128xf32>
    %cst_106 = arith.constant dense<0.000000e+00> : vector<1x128xf32>
    %116 = vector.multi_reduction <add>, %113, %cst_106 [1] : vector<1x30x128xf32> to vector<1x128xf32>
    %117 = vector.shape_cast %115 : vector<1x1x128xf32> to vector<1x128xf32>
    %cst_107 = arith.constant 2.000000e+00 : f32
    %118 = vector.broadcast %cst_107 : f32 to vector<1x128xf32>
    %119 = arith.mulf %118, %117 : vector<1x128xf32>
    %120 = arith.addf %116, %119 : vector<1x128xf32>
    %cst_108 = arith.constant 3.125000e-02 : f32
    %121 = vector.broadcast %cst_108 : f32 to vector<1x128xf32>
    %122 = arith.mulf %120, %121 : vector<1x128xf32>
    %c9 = arith.constant 9 : index
    %c0_109 = arith.constant 0 : index
    %123 = vector.load %arg6[%c9, %c0_109] : memref<10x128xf32, #tpu.memory_space<vmem>>, vector<1x128xf32>
    %124 = arith.truncf %122 : vector<1x128xf32> to vector<1x128xbf16>
    %c0_110 = arith.constant 0 : index
    %c0_111 = arith.constant 0 : index
    %125 = vector.load %arg7[%c0_110, %c0_111] : memref<128x128xbf16, #tpu.memory_space<vmem>>, vector<128x128xbf16>
    %cst_112 = arith.constant dense<0.000000e+00> : vector<1x128xf32>
    %126 = tpu.matmul %124, %125, %cst_112 {dimension_numbers = #tpu.dot_dimension_numbers<[1], [0], [0], [1], [0, 0, 1, 1], [], []>} : vector<1x128xbf16>, vector<128x128xbf16>, vector<1x128xf32> -> vector<1x128xf32>
    %127 = arith.addf %126, %123 : vector<1x128xf32>
    %cst_113 = arith.constant 0.000000e+00 : f32
    %128 = vector.broadcast %cst_113 : f32 to vector<1x128xf32>
    %129 = arith.maximumf %127, %128 : vector<1x128xf32>
    %c8 = arith.constant 8 : index
    %c0_114 = arith.constant 0 : index
    %130 = vector.load %arg6[%c8, %c0_114] : memref<10x128xf32, #tpu.memory_space<vmem>>, vector<1x128xf32>
    %131 = arith.truncf %129 : vector<1x128xf32> to vector<1x128xbf16>
    %c0_115 = arith.constant 0 : index
    %c0_116 = arith.constant 0 : index
    %132 = vector.load %arg8[%c0_115, %c0_116] : memref<128x128xbf16, #tpu.memory_space<vmem>>, vector<128x128xbf16>
    %cst_117 = arith.constant dense<0.000000e+00> : vector<1x128xf32>
    %133 = tpu.matmul %131, %132, %cst_117 {dimension_numbers = #tpu.dot_dimension_numbers<[1], [0], [0], [1], [0, 0, 1, 1], [], []>} : vector<1x128xbf16>, vector<128x128xbf16>, vector<1x128xf32> -> vector<1x128xf32>
    %134 = arith.addf %133, %130 : vector<1x128xf32>
    %cst_118 = arith.constant 0.000000e+00 : f32
    %135 = vector.broadcast %cst_118 : f32 to vector<1x128xf32>
    %136 = arith.subf %135, %134 : vector<1x128xf32>
    %137 = math.exp %136 : vector<1x128xf32>
    %cst_119 = arith.constant 1.000000e+00 : f32
    %138 = vector.broadcast %cst_119 : f32 to vector<1x128xf32>
    %139 = arith.addf %138, %137 : vector<1x128xf32>
    %cst_120 = arith.constant 1.000000e+00 : f32
    %140 = vector.broadcast %cst_120 : f32 to vector<1x128xf32>
    %141 = arith.divf %140, %139 : vector<1x128xf32>
    %142 = vector.shape_cast %141 : vector<1x128xf32> to vector<1x1x128xf32>
    %143 = vector.extract_strided_slice %20 {offsets = [0, 0, 0], sizes = [1, 30, 128], strides = [1, 1, 1]} : vector<1x32x128xf32> to vector<1x30x128xf32>
    %144 = vector.broadcast %142 : vector<1x1x128xf32> to vector<1x30x128xf32>
    %145 = arith.mulf %113, %144 : vector<1x30x128xf32>
    %146 = arith.addf %143, %145 : vector<1x30x128xf32>
    %cst_121 = arith.constant 0.000000e+00 : f32
    %147 = vector.broadcast %cst_121 : f32 to vector<1x30x128xf32>
    %148 = arith.maximumf %146, %147 : vector<1x30x128xf32>
    %c0_122 = arith.constant 0 : index
    %c0_123 = arith.constant 0 : index
    %c0_124 = arith.constant 0 : index
    %149 = vector.load %arg9[%c0_122, %c0_123, %c0_124] : memref<1x32x128xf32, #tpu.memory_space<vmem>>, vector<1x30x128xf32>
    tpu.vector_store %arg9[%c0_122, %c0_123, %c0_124], %148 {strides = array<i32>} : memref<1x32x128xf32, #tpu.memory_space<vmem>>, vector<1x30x128xf32>,
    %150 = vector.extract_strided_slice %20 {offsets = [0, 30, 0], sizes = [1, 2, 128], strides = [1, 1, 1]} : vector<1x32x128xf32> to vector<1x2x128xf32>
    %151 = arith.mulf %115, %142 : vector<1x1x128xf32>
    %152 = vector.broadcast %151 : vector<1x1x128xf32> to vector<1x2x128xf32>
    %153 = arith.addf %150, %152 : vector<1x2x128xf32>
    %cst_125 = arith.constant 0.000000e+00 : f32
    %154 = vector.broadcast %cst_125 : f32 to vector<1x2x128xf32>
    %155 = arith.maximumf %153, %154 : vector<1x2x128xf32>
    %c0_126 = arith.constant 0 : index
    %c30_127 = arith.constant 30 : index
    %c0_128 = arith.constant 0 : index
    %156 = vector.load %arg9[%c0_126, %c30_127, %c0_128] : memref<1x32x128xf32, #tpu.memory_space<vmem>>, vector<1x2x128xf32>
    tpu.vector_store %arg9[%c0_126, %c30_127, %c0_128], %155 {strides = array<i32>} : memref<1x32x128xf32, #tpu.memory_space<vmem>>, vector<1x2x128xf32>,
    return
  }
  func.func @transform_0(%arg0: i32) -> (i32, i32, i32) {
    %c0_i32 = arith.constant 0 : i32
    %c0_i32_0 = arith.constant 0 : i32
    %c0_i32_1 = arith.constant 0 : i32
    return %arg0, %c0_i32, %c0_i32_0 : i32, i32, i32
  }
  func.func @transform_1(%arg0: i32) -> (i32, i32, i32) {
    %c0_i32 = arith.constant 0 : i32
    %c0_i32_0 = arith.constant 0 : i32
    %c0_i32_1 = arith.constant 0 : i32
    return %arg0, %c0_i32, %c0_i32_0 : i32, i32, i32
  }
  func.func @transform_2(%arg0: i32) -> (i32, i32, i32) {
    %c0_i32 = arith.constant 0 : i32
    %c0_i32_0 = arith.constant 0 : i32
    %c0_i32_1 = arith.constant 0 : i32
    %c0_i32_2 = arith.constant 0 : i32
    return %c0_i32, %c0_i32_0, %c0_i32_1 : i32, i32, i32
  }
  func.func @transform_3(%arg0: i32) -> (i32, i32, i32) {
    %c0_i32 = arith.constant 0 : i32
    %c0_i32_0 = arith.constant 0 : i32
    %c0_i32_1 = arith.constant 0 : i32
    %c0_i32_2 = arith.constant 0 : i32
    return %c0_i32, %c0_i32_0, %c0_i32_1 : i32, i32, i32
  }
  func.func @transform_4(%arg0: i32) -> (i32, i32, i32, i32) {
    %c0_i32 = arith.constant 0 : i32
    %c0_i32_0 = arith.constant 0 : i32
    %c0_i32_1 = arith.constant 0 : i32
    %c0_i32_2 = arith.constant 0 : i32
    %c0_i32_3 = arith.constant 0 : i32
    return %c0_i32, %c0_i32_0, %c0_i32_1, %c0_i32_2 : i32, i32, i32, i32
  }
  func.func @transform_5(%arg0: i32) -> (i32, i32) {
    %c0_i32 = arith.constant 0 : i32
    %c0_i32_0 = arith.constant 0 : i32
    %c0_i32_1 = arith.constant 0 : i32
    return %c0_i32, %c0_i32_0 : i32, i32
  }
  func.func @transform_6(%arg0: i32) -> (i32, i32) {
    %c0_i32 = arith.constant 0 : i32
    %c0_i32_0 = arith.constant 0 : i32
    %c0_i32_1 = arith.constant 0 : i32
    return %c0_i32, %c0_i32_0 : i32, i32
  }
  func.func @transform_7(%arg0: i32) -> (i32, i32) {
    %c0_i32 = arith.constant 0 : i32
    %c0_i32_0 = arith.constant 0 : i32
    %c0_i32_1 = arith.constant 0 : i32
    return %c0_i32, %c0_i32_0 : i32, i32
  }
  func.func @transform_8(%arg0: i32) -> (i32, i32, i32) {
    %c0_i32 = arith.constant 0 : i32
    %c0_i32_0 = arith.constant 0 : i32
    %c0_i32_1 = arith.constant 0 : i32
    return %arg0, %c0_i32, %c0_i32_0 : i32, i32, i32
  }
  func.func @transform_9(%arg0: i32) -> (i32, i32, i32) {
    %c0_i32 = arith.constant 0 : i32
    %c0_i32_0 = arith.constant 0 : i32
    %c0_i32_1 = arith.constant 0 : i32
    return %arg0, %c0_i32, %c0_i32_0 : i32, i32, i32
  }
}

</mosaic_0001>

<bundles_post_ra>
// kernel: easter_unit.1
= control target key start
LH: loop header
LB: loop body
LE: loop exit
PB: predicated region body
PF: predicated region fallthrough
CT: control target
= control target key end

     0   :  { %15 = vsyncpa [#allocation5], 0  ;;  %s3575_s0 = inlined_call_operand.vmem [shape: bf16[2,32,128], index: 0, kind: input, shape index: {}]   ;;  %s3576_s1 = inlined_call_operand.vmem [shape: bf16[2,32,128], index: 1, kind: input, shape index: {}]   ;;  %s3577_s2 = inlined_call_operand.hbm [shape: bf16[2,128,128], index: 2, kind: input, shape index: {}]   ;;  %s3578_s3 = inlined_call_operand.vmem [shape: bf16[3,128,128], index: 3, kind: input, shape index: {}]   ;;  %s3579_s4 = inlined_call_operand.hbm [shape: bf16[2,3,128,128], index: 4, kind: input, shape index: {}]   ;;  %s3580_s5 = inlined_call_operand.vmem [shape: f32[10,128], index: 5, kind: input, shape index: {}]   ;;  %s3581_s6 = inlined_call_operand.vmem [shape: bf16[128,128], index: 6, kind: input, shape index: {}]   ;;  %s3582_s7 = inlined_call_operand.hbm [shape: bf16[128,128], index: 7, kind: input, shape index: {}]   ;;  %s3583_s8 = inlined_call_operand.vmem [shape: f32[2,32,128], index: 8, kind: output, shape index: {0}]   ;;  %s3584_s9 = inlined_call_operand.vmem [shape: f32[2,32,128], index: 9, kind: output, shape index: {1}]  }
   0x1   :  { %16 = vsyncpa [#allocation7], 0  ;;  %s3214_s30 = smov 0  }
   0x2 LB: > { %s3220_s10 = sadd.s32 4294967295, %s3155_s30   ;;  %p2300_p0 = scmp.ge.s32.totalorder %s3155_s30, 1  ;;  %s3155_s30 = sphi %s3214_s30, %s22_s30  }
   0x3   : > { %p257_p1 = scmp.lt.s32.totalorder %s3155_s30, 3  ;;  %p3585_p2 = scmp.eq.s32.totalorder %s3220_s10, 0 }
   0x4   : > { %s3157_s12 = smov [#allocation6]   ;;  %s3158_s14 = smov [#allocation4]  }
   0x5   : > { %p3225_p3 = pnand %p2300_p0, %p257_p1  ;;  %s285_s13 = sshll.u32 %s3157_s12, 4  ;;  %s286_s13 = int_to_ptr.vmem [resolvable:$true] %s285_s13 }
   0x6   : > { %s269_s15 = sshll.u32 %s3158_s14, 4  ;;  %s3159_s17 = smov [#allocation8]   ;;  %s3237_s15 = int_to_ptr.vmem [resolvable:$true] %s269_s15 }
   0x7   : > { %s3587_s11 = scalar_select %p3225_p3, 1, 0 }
   0x8   : > { %p2910_p4 = pneg %p3225_p3  ;;  %s304_s18 = sshll.u32 %s3159_s17, 4  ;;  %s3239_s18 = int_to_ptr.vmem [resolvable:$true] %s304_s18 }
   0x9   : > { %s3057_s21 = scalar_lea.hbm %s3579_s4, 6144 }
   0xa   : > { %p3233_p5 = pnand %p3585_p2, %p2910_p4  ;;  %p3058_p6 = scmp.ne.s32.totalorder %s3579_s4, %s3057_s21 }
   0xb   : > { %p3064_p10 = scmp.lt.u32.totalorder %s3057_s21, %s3579_s4 }
   0xc   : > { %p3249_p7 = pneg %p3233_p5 }
   0xe   : > { %p3060_p8 = pnand %p3249_p7, %p3058_p6 }
  0x10   : > { %p3061_p9 = pneg %p3060_p8 }
  0x12   : > { %p3066_p11 = pnand %p3064_p10, %p3061_p9 }
  0x14   : > { %3069 = shalt.err (!%p3066_p11)
}
  0x15   : > { %s3070_s27 = scalar_lea.vmem %s286_s13, 6144  ;;  %p3078_p1 = scmp.lt.s32.totalorder %s286_s13, %s286_s13 }
  0x16   : > { %p3071_p12 = scmp.ne.s32.totalorder %s286_s13, %s3070_s27  ;;  %p3079_p4 = scmp.lt.s32.totalorder %s3070_s27, %s3070_s27 }
  0x18   : > { %p3073_p13 = pnand %p3071_p12, %p3249_p7  ;;  %p3080_p2 = por %p3079_p4, %p3078_p1 }
  0x1a   : > { %p3074_p0 = pneg %p3073_p13 }
  0x1c   : > { %p3081_p3 = pnand %p3080_p2, %p3074_p0 }
  0x1e   : > { %3084 = shalt.err (!%p3081_p3)
}
  0x1f   : > { %s3160_s28 = smov 64   ;;  %s3161_s29 = smov 4  }
  0x20   : > { %2916 = dma.hbm_to_vmem [thread:$0]  (!%p3233_p5), %s3579_s4, 6144, %s286_s13, [#allocation7], %s3160_s28, %s3160_s28, %s3161_s29  }
  0x21   : > { %s3085_s20 = scalar_lea.hbm %s3577_s2, 2048 }
  0x22   : > { %p3086_p2 = scmp.ne.s32.totalorder %s3577_s2, %s3085_s20  ;;  %p3092_p8 = scmp.lt.u32.totalorder %s3085_s20, %s3577_s2 }
  0x24   : > { %p3088_p3 = pnand %p3086_p2, %p3249_p7 }
  0x26   : > { %p3089_p6 = pneg %p3088_p3 }
  0x28   : > { %p3094_p9 = pnand %p3092_p8, %p3089_p6 }
  0x2a   : > { %3097 = shalt.err (!%p3094_p9)
}
  0x2b   : > { %s3098_s13 = scalar_lea.vmem %s3237_s15, 2048  ;;  %p3106_p13 = scmp.lt.s32.totalorder %s3237_s15, %s3237_s15 }
  0x2c   : > { %p3099_p10 = scmp.ne.s32.totalorder %s3237_s15, %s3098_s13  ;;  %p3107_p0 = scmp.lt.s32.totalorder %s3098_s13, %s3098_s13 }
  0x2e   : > { %p3101_p11 = pnand %p3099_p10, %p3249_p7  ;;  %p3108_p1 = por %p3107_p0, %p3106_p13 }
  0x30   : > { %p3102_p12 = pneg %p3101_p11 }
  0x32   : > { %p3109_p4 = pnand %p3108_p1, %p3102_p12 }
  0x34   : > { %3112 = shalt.err (!%p3109_p4)
}
  0x35   : > { %2913 = dma.hbm_to_vmem [thread:$0]  (!%p3233_p5), %s3577_s2, 2048, %s3237_s15, [#allocation5], %s3160_s28, %s3160_s28, %s3161_s29  }
  0x36   : > { %s3113_s17 = scalar_lea.hbm %s3582_s7, 1024 }
  0x37   : > { %p3114_p2 = scmp.ne.s32.totalorder %s3582_s7, %s3113_s17  ;;  %p3120_p8 = scmp.lt.u32.totalorder %s3113_s17, %s3582_s7 }
  0x39   : > { %p3116_p3 = pnand %p3114_p2, %p3249_p7 }
  0x3b   : > { %p3117_p6 = pneg %p3116_p3 }
  0x3d   : > { %p3122_p9 = pnand %p3120_p8, %p3117_p6 }
  0x3f   : > { %3125 = shalt.err (!%p3122_p9)
}
  0x40   : > { %s3126_s15 = scalar_lea.vmem %s3239_s18, 1024  ;;  %p3134_p13 = scmp.lt.s32.totalorder %s3239_s18, %s3239_s18 }
  0x41   : > { %p3127_p10 = scmp.ne.s32.totalorder %s3239_s18, %s3126_s15  ;;  %p3135_p0 = scmp.lt.s32.totalorder %s3126_s15, %s3126_s15 }
  0x43   : > { %p3129_p11 = pnand %p3127_p10, %p3249_p7  ;;  %p3136_p1 = por %p3135_p0, %p3134_p13 }
  0x45   : > { %p3130_p12 = pneg %p3129_p11 }
  0x47   : > { %p3137_p4 = pnand %p3136_p1, %p3130_p12 }
  0x49   : > { %3140 = shalt.err (!%p3137_p4)
}
  0x4a   : > { %2919 = dma.hbm_to_vmem [thread:$0]  (!%p3233_p5), %s3582_s7, 1024, %s3239_s18, [#allocation7], %s3160_s28, %s3160_s28, %s3161_s29  }
  0x4b   : > { %p3590_p2 = scmp.ne.s32.totalorder %s3587_s11, 0 }
  0x4c   : > { %p3591_p7 = scmp.eq.s32.totalorder (!%p3590_p2), %s3220_s10, 0 }
  0x4d   : > { %336 = sbr.rel (%p3590_p2) target bundleno = 1482 (0x5ca), region = 52 }
  0x54   : > { %3146 = dma.done.wait (%p3591_p7), [#allocation5], 2048   ;;  %p3592_p3 = pmov %p3591_p7 }
  0x56   : > { %3148 = vsyncadd (%p3592_p3), [#allocation5], 4294965248  ;;  %p3593_p6 = pmov %p3592_p3 }
  0x57   : > { %p3594_p8 = pmov %p3592_p3 }
  0x58   : > { %3150 = dma.done.wait (%p3593_p6), [#allocation7], 7168  }
  0x59   : > { %3152 = vsyncadd (%p3594_p8), [#allocation7], 4294960128  ;;  %p390_p9 = scmp.lt.s32.totalorder %s3220_s10, 1  ;;  %v2941_v0 = vld [vmem:[%s3578_s3] sm:$0xff]   ;;  %v2942_v1 = vld [vmem:[%s3578_s3 + $0x8] sm:$0xff]   ;;  %vm986_vm1 = vcmask 1046528  }
  0x5a   : > { %2642 = vmatprep.subr.bf16.mxu1 %v2941_v0  ;;  %v2943_v2 = vld [vmem:[%s3578_s3 + $0x10] sm:$0xff]   ;;  %v2944_v3 = vld [vmem:[%s3578_s3 + $0x18] sm:$0xff]   ;;  %v2945_v7 = vld [vmem:[%s3578_s3 + $0x20] sm:$0xff]   ;;  %vm846_vm0 = vsmask.f32 7424  ;;  %vm3163_vm2 = vmmov 0  }
  0x5b   : > { %s3596_s10 = smov (!%p390_p9, %s3220_s10), 1  ;;  %2643 = vmatpush3.bf16.msra.mxu1 %v2941_v0  ;;  %v2946_v8 = vld [vmem:[%s3578_s3 + $0x28] sm:$0xff]   ;;  %v2947_v11 = vld [vmem:[%s3578_s3 + $0x30] sm:$0xff]   ;;  %v2948_v14 = vld [vmem:[%s3578_s3 + $0x38] sm:$0xff]   ;;  %vm1908_vm3 = vcmask 1045504  }
  0x5c   : > { %s2470_s28 = sshll.u32 %s3596_s10, 4  ;;  %2644 = vmatprep.subr.bf16.mxu1 %v2942_v1  ;;  %v2969_v19 = vld [vmem:[#allocation4] sm:$0xff]   ;;  %v2970_v20 = vld [vmem:[#allocation4 + $0x8] sm:$0xff]   ;;  %v2971_v25 = vld [vmem:[#allocation4 + $0x10] sm:$0xff]   ;;  %s2472_s24 = sshll.u32 %s3596_s10, 5 }
  0x5d   : > { %s3349_s12 = scalar_lea.vmem %s3576_s1, %s2470_s28  ;;  %v2951_v21 = vld [vmem:[%s3578_s3 + $0x40] sm:$0xff]   ;;  %2602 = vmatprep.subr.bf16.mxu0 %v2969_v19  ;;  %s3387_s13 = scalar_lea.vmem %s3575_s0, %s2470_s28  ;;  %v2954_v26 = vld [vmem:[%s3578_s3 + $0x48] sm:$0xff]   ;;  %v2972_v28 = vld [vmem:[#allocation4 + $0x18] sm:$0xff]  }
  0x5e   : > { %v696_v4 = vld [vmem:[%s3349_s12] sm:$0xf]  ;;  %v3356_v5 = vld [vmem:[%s3349_s12 + $0x4] sm:$0xf]  ;;  %v825_v9 = vld [vmem:[%s3349_s12 + $0xc] sm:$0xf]  ;;  %2603 = vmatpush3.bf16.msra.mxu0 %v2969_v19  ;;  %s409_s28 = scalar_lea.vmem %s3584_s9, %s2472_s24 }
  0x5f   : > { %2645 = vmatpush3.bf16.msra.mxu1 %v2942_v1  ;;  %v2339_v6 = vcombine.low %v696_v4, %v3356_v5  ;;  %v698_v10 = vld [vmem:[%s3349_s12 + $0x8] sm:$0xf]  ;;  %v699_v18 = vld [vmem:[%s3349_s12 + $0xc] sm:$0x7]  ;;  %2604 = vmatprep.subr.bf16.mxu0 %v2970_v20  ;;  %v2977_v29 = vld [vmem:[%s3387_s13] sm:$0xff]  }
  0x60   : > { %2646 = vmatprep.subr.bf16.mxu1 %v2943_v2  ;;  %v3370_v13 = vcombine.low %v698_v10, %v825_v9  ;;  %v2340_v24 = vcombine.low %v698_v10, %v699_v18  ;;  %v2955_v30 = vld [vmem:[%s3578_s3 + $0x50] sm:$0xff]   ;;  %2618 = vmatprep.mubr.bf16.mxu0 %v2977_v29  ;;  %v2973_v31 = vld [vmem:[#allocation4 + $0x20] sm:$0xff]   ;;  %v2956_v32 = vld [vmem:[%s3578_s3 + $0x58] sm:$0xff]  }
  0x61   : > { %2658 = vmatprep.mubr.bf16.mxu1 %v2339_v6  ;;  %v850_v12 = vshll.u32 %v2339_v6, 16  ;;  %v848_v15 = vshrl.u32 %v2339_v6, 16  ;;  %v965_v33 = vld [vmem:[%s3349_s12] sm:$0xe]  ;;  %v2974_v34 = vld [vmem:[#allocation4 + $0x28] sm:$0xff]   ;;  %v2975_v37 = vld [vmem:[#allocation4 + $0x30] sm:$0xff]  }
  0x62   : > { %v855_v17 = vshll.u32 %v3370_v13, 16  ;;  %2605 = vmatpush3.bf16.msra.mxu0 %v2970_v20  ;;  %v2390_v35 = vcombine.low %v965_v33, %v3356_v5  ;;  %v2957_v36 = vld [vmem:[%s3578_s3 + $0x60] sm:$0xff]   ;;  %v2958_v38 = vld [vmem:[%s3578_s3 + $0x68] sm:$0xff]   ;;  %v859_v39 = vshrl.u32 %v3370_v13, 16  ;;  %v988_v41 = vrot.slane %v3370_v13, 1  ;;  %v2976_v42 = vld [vmem:[#allocation4 + $0x38] sm:$0xff]  }
  0x63   : > { %2647 = vmatpush3.bf16.msra.mxu1 %v2943_v2  ;;  %v852_v16 = vrot.slane %v850_v12, 1  ;;  %2606 = vmatprep.subr.bf16.mxu0 %v2971_v25  ;;  %v2959_v43 = vld [vmem:[%s3578_s3 + $0x70] sm:$0xff]   ;;  %v2978_v44 = vld [vmem:[#allocation4 + $0x40] sm:$0xff]   ;;  %v2960_v45 = vld [vmem:[%s3578_s3 + $0x78] sm:$0xff]  }
  0x64   : > { %2648 = vmatprep.subr.bf16.mxu1 %v2944_v3  ;;  %v3380_v23 = vrot.slane %v855_v17, 1  ;;  %v987_v40 = vrot.slane %v2390_v35, 1  ;;  %v2979_v46 = vld [vmem:[%s3387_s13 + $0x8] sm:$0xff]   ;;  %v2987_v47 = vld [vmem:[%s3349_s12] sm:$0xff]   ;;  %v2981_v50 = vld [vmem:[#allocation4 + $0x50] sm:$0xff]   ;;  %s404_s13 = scalar_lea.vmem %s3583_s8, %s2472_s24 }
  0x65   : > { %v853_v22 = vor.u32 %v852_v16, %v848_v15  ;;  %v2980_v48 = vld [vmem:[#allocation4 + $0x48] sm:$0xff]   ;;  %v2961_v49 = vld [vmem:[%s3578_s3 + $0x80] sm:$0xff]   ;;  %v2982_v54 = vld [vmem:[#allocation4 + $0x58] sm:$0xff]  }
  0x66   : > { %2607 = vmatpush3.bf16.msra.mxu0 %v2971_v25  ;;  %v861_v51 = vor.u32 %v859_v39, %v3380_v23  ;;  %v2962_v52 = vld [vmem:[%s3578_s3 + $0x88] sm:$0xff]   ;;  %v989_v53 = vsel %vm986_vm1, %v987_v40, %v988_v41  ;;  %v2963_v55 = vld [vmem:[%s3578_s3 + $0x90] sm:$0xff]   ;;  %v2983_v56 = vld [vmem:[#allocation4 + $0x60] sm:$0xff]  }
  0x67   : > { %2649 = vmatpush3.bf16.msra.mxu1 %v2944_v3  ;;  %v858_v27 = vsel %vm846_vm0, %v853_v22, %v3380_v23  ;;  %2608 = vmatprep.subr.bf16.mxu0 %v2972_v28  ;;  %v2964_v57 = vld [vmem:[%s3578_s3 + $0x98] sm:$0xff]   ;;  %v2984_v58 = vld [vmem:[#allocation4 + $0x68] sm:$0xff]   ;;  %v2965_v59 = vld [vmem:[%s3578_s3 + $0xa0] sm:$0xff]  }
  0x68   : > { %2650 = vmatprep.subr.bf16.mxu1 %v2945_v7  ;;  %v2985_v60 = vld [vmem:[#allocation4 + $0x70] sm:$0xff]   ;;  %v2966_v61 = vld [vmem:[%s3578_s3 + $0xa8] sm:$0xff]   ;;  %v2986_v62 = vld [vmem:[#allocation4 + $0x78] sm:$0xff]  }
  0x69   : > { %v2967_v63 = vld [vmem:[%s3578_s3 + $0xb0] sm:$0xff]   ;;  %v2989_v0 = vld [vmem:[#allocation6] sm:$0xff]   ;;  %v2968_v1 = vld [vmem:[%s3578_s3 + $0xb8] sm:$0xff]  }
  0x6a   : > { %2609 = vmatpush3.bf16.msra.mxu0 %v2972_v28  ;;  %v2988_v2 = vld [vmem:[%s3349_s12 + $0x8] sm:$0xff]   ;;  %v2991_v4 = vld [vmem:[#allocation6 + $0x10] sm:$0xff]   ;;  %v2992_v5 = vld [vmem:[#allocation6 + $0x18] sm:$0xff]  }
  0x6b   : > { %2651 = vmatpush3.bf16.msra.mxu1 %v2945_v7  ;;  %2610 = vmatprep.subr.bf16.mxu0 %v2973_v31  ;;  %v2990_v3 = vld [vmem:[#allocation6 + $0x8] sm:$0xff]   ;;  %v2993_v6 = vld [vmem:[#allocation6 + $0x20] sm:$0xff]   ;;  %v3015_v15 = vld [vmem:[#allocation6 + $0xd0] sm:$0xff]  }
  0x6c   : > { %2652 = vmatprep.subr.bf16.mxu1 %v2946_v8  ;;  %v2994_v7 = vld [vmem:[#allocation6 + $0x28] sm:$0xff]   ;;  %v2400_v9 = vld [vmem:[%s3580_s5 + $0x3] ss:$0 sm:$0xff]  ;;  %v3016_v16 = vld [vmem:[#allocation6 + $0xd8] sm:$0xff]  }
  0x6d   : > { %v1115_v10 = vpack.c.bf16 %v2400_v9, %v2400_v9  ;;  %v2997_v12 = vld [vmem:[#allocation6 + $0x40] sm:$0xff]   ;;  %v3010_v9 = vld [vmem:[#allocation6 + $0xa8] sm:$0xff]  }
  0x6e   : > { %2611 = vmatpush3.bf16.msra.mxu0 %v2973_v31  ;;  %v3013_v13 = vld [vmem:[#allocation6 + $0xc0] sm:$0xff]  }
  0x6f   : > { %2653 = vmatpush3.bf16.msra.mxu1 %v2946_v8  ;;  %2612 = vmatprep.subr.bf16.mxu0 %v2974_v34  ;;  %v2995_v8 = vld [vmem:[#allocation6 + $0x30] sm:$0xff]   ;;  %1116 = vst [vmem:[#allocation2 + $0x8] sm:$0x80] %v1115_v10  ;;  %v2327_v17 = vld [vmem:[%s3580_s5] ss:$0 sm:$0xff] }
  0x70   : > { %2654 = vmatprep.subr.bf16.mxu1 %v2947_v11  ;;  %v2338_v19 = vld [vmem:[%s3580_s5 + $0x1] ss:$0 sm:$0xff]  ;;  %v3011_v10 = vld [vmem:[#allocation6 + $0xb0] sm:$0xff]  }
  0x72   : > { %2613 = vmatpush3.bf16.msra.mxu0 %v2974_v34 }
  0x73   : > { %2655 = vmatpush3.bf16.msra.mxu1 %v2947_v11  ;;  %2614 = vmatprep.subr.bf16.mxu0 %v2975_v37  ;;  %v2996_v11 = vld [vmem:[#allocation6 + $0x38] sm:$0xff]  }
  0x74   : > { %2656 = vmatprep.subr.bf16.mxu1 %v2948_v14 }
  0x76   : > { %2615 = vmatpush3.bf16.msra.mxu0 %v2975_v37 }
  0x77   : > { %2657 = vmatpush3.bf16.msra.mxu1 %v2948_v14  ;;  %2616 = vmatprep.subr.bf16.mxu0 %v2976_v42  ;;  %v3014_v14 = vld [vmem:[#allocation6 + $0xc8] sm:$0xff]  }
  0x78   : > { %2662 = vmatprep.subr.bf16.mxu1 %v2951_v21 }
  0x7a   : > { %2659 = vmatmul.mubr.bf16.vlgmr.msra.gmra.mrb[0].mxu1 %v2340_v24  ;;  %2617 = vmatpush3.bf16.msra.mxu0 %v2976_v42 }
  0x7b   : > { %2663 = vmatpush3.bf16.msra.mxu1 %v2951_v21  ;;  %2678 = vmatprep.mubr.bf16.mxu1 %v858_v27  ;;  %v2399_v27 = vld [vmem:[%s3580_s5 + $0x2] ss:$0 sm:$0xff] }
  0x7c   : > { %2664 = vmatprep.subr.bf16.mxu1 %v2954_v26  ;;  %2622 = vmatprep.subr.bf16.mxu0 %v2978_v44 }
  0x7d   : > { %2619 = vmatmul.mubr.bf16.vlgmr.msra.gmra.mrb[0].mxu0 %v2979_v46 }
  0x7e   : > { %2623 = vmatpush3.bf16.msra.mxu0 %v2978_v44  ;;  %2638 = vmatprep.mubr.bf16.mxu0 %v2987_v47 }
  0x7f   : > { %2665 = vmatpush3.bf16.msra.mxu1 %v2954_v26  ;;  %2624 = vmatprep.subr.bf16.mxu0 %v2980_v48 }
  0x80   : > { %2666 = vmatprep.subr.bf16.mxu1 %v2955_v30 }
  0x82   : > { %2625 = vmatpush3.bf16.msra.mxu0 %v2980_v48  ;;  %v2998_v48 = vld [vmem:[#allocation6 + $0x48] sm:$0xff]  }
  0x83   : > { %2667 = vmatpush3.bf16.msra.mxu1 %v2955_v30  ;;  %2626 = vmatprep.subr.bf16.mxu0 %v2981_v50 }
  0x84   : > { %2668 = vmatprep.subr.bf16.mxu1 %v2956_v32 }
  0x86   : > { %2627 = vmatpush3.bf16.msra.mxu0 %v2981_v50 }
  0x87   : > { %2669 = vmatpush3.bf16.msra.mxu1 %v2956_v32  ;;  %2628 = vmatprep.subr.bf16.mxu0 %v2982_v54 }
  0x88   : > { %2670 = vmatprep.subr.bf16.mxu1 %v2957_v36 }
  0x8a   : > { %2629 = vmatpush3.bf16.msra.mxu0 %v2982_v54 }
  0x8b   : > { %2671 = vmatpush3.bf16.msra.mxu1 %v2957_v36  ;;  %2630 = vmatprep.subr.bf16.mxu0 %v2983_v56 }
  0x8c   : > { %2672 = vmatprep.subr.bf16.mxu1 %v2958_v38 }
  0x8e   : > { %2631 = vmatpush3.bf16.msra.mxu0 %v2983_v56 }
  0x8f   : > { %2673 = vmatpush3.bf16.msra.mxu1 %v2958_v38  ;;  %2632 = vmatprep.subr.bf16.mxu0 %v2984_v58 }
  0x90   : > { %2674 = vmatprep.subr.bf16.mxu1 %v2959_v43 }
  0x92   : > { %2633 = vmatpush3.bf16.msra.mxu0 %v2984_v58  ;;  %v3001_v58 = vld [vmem:[#allocation6 + $0x60] sm:$0xff]  }
  0x93   : > { %2675 = vmatpush3.bf16.msra.mxu1 %v2959_v43  ;;  %2634 = vmatprep.subr.bf16.mxu0 %v2985_v60 }
  0x94   : > { %2676 = vmatprep.subr.bf16.mxu1 %v2960_v45 }
  0x96   : > { %2635 = vmatpush3.bf16.msra.mxu0 %v2985_v60  ;;  %v3003_v60 = vld [vmem:[#allocation6 + $0x70] sm:$0xff]  }
  0x97   : > { %2677 = vmatpush3.bf16.msra.mxu1 %v2960_v45  ;;  %2636 = vmatprep.subr.bf16.mxu0 %v2986_v62 }
  0x98   : > { %2682 = vmatprep.subr.bf16.mxu1 %v2961_v49 }
  0x9a   : > { %2679 = vmatmul.mubr.bf16.vlgmr.msra.gmra.mrb[0].mxu1 %v861_v51  ;;  %2637 = vmatpush3.bf16.msra.mxu0 %v2986_v62 }
  0x9b   : > { %2683 = vmatpush3.bf16.msra.mxu1 %v2961_v49  ;;  %2698 = vmatprep.mubr.bf16.mxu1 %v989_v53 }
  0x9c   : > { %2684 = vmatprep.subr.bf16.mxu1 %v2962_v52  ;;  %2702 = vmatprep.subr.bf16.mxu0 %v2989_v0 }
  0x9d   : > { %2639 = vmatmul.mubr.bf16.vlgmr.msra.gmra.mrb[0].mxu0 %v2988_v2 }
  0x9e   : > { %2703 = vmatpush3.bf16.msra.mxu0 %v2989_v0 }
  0x9f   : > { %2685 = vmatpush3.bf16.msra.mxu1 %v2962_v52  ;;  %2704 = vmatprep.subr.bf16.mxu0 %v2990_v3 }
  0xa0   : > { %2686 = vmatprep.subr.bf16.mxu1 %v2963_v55 }
  0xa2   : > { %2705 = vmatpush3.bf16.msra.mxu0 %v2990_v3 }
  0xa3   : > { %2687 = vmatpush3.bf16.msra.mxu1 %v2963_v55  ;;  %2706 = vmatprep.subr.bf16.mxu0 %v2991_v4  ;;  %v2999_v55 = vld [vmem:[#allocation6 + $0x50] sm:$0xff]  }
  0xa4   : > { %2688 = vmatprep.subr.bf16.mxu1 %v2964_v57 }
  0xa6   : > { %2707 = vmatpush3.bf16.msra.mxu0 %v2991_v4  ;;  %v3006_v4 = vld [vmem:[#allocation6 + $0x88] sm:$0xff]  }
  0xa7   : > { %2689 = vmatpush3.bf16.msra.mxu1 %v2964_v57  ;;  %2708 = vmatprep.subr.bf16.mxu0 %v2992_v5  ;;  %v3000_v57 = vld [vmem:[#allocation6 + $0x58] sm:$0xff]  }
  0xa8   : > { %2690 = vmatprep.subr.bf16.mxu1 %v2965_v59 }
  0xaa   : > { %2709 = vmatpush3.bf16.msra.mxu0 %v2992_v5 }
  0xab   : > { %2691 = vmatpush3.bf16.msra.mxu1 %v2965_v59  ;;  %2710 = vmatprep.subr.bf16.mxu0 %v2993_v6  ;;  %v3002_v59 = vld [vmem:[#allocation6 + $0x68] sm:$0xff]  }
  0xac   : > { %2692 = vmatprep.subr.bf16.mxu1 %v2966_v61 }
  0xae   : > { %2711 = vmatpush3.bf16.msra.mxu0 %v2993_v6  ;;  %v3007_v6 = vld [vmem:[#allocation6 + $0x90] sm:$0xff]  }
  0xaf   : > { %2693 = vmatpush3.bf16.msra.mxu1 %v2966_v61  ;;  %2712 = vmatprep.subr.bf16.mxu0 %v2994_v7  ;;  %v3004_v61 = vld [vmem:[#allocation6 + $0x78] sm:$0xff]  }
  0xb0   : > { %2694 = vmatprep.subr.bf16.mxu1 %v2967_v63 }
  0xb2   : > { %2713 = vmatpush3.bf16.msra.mxu0 %v2994_v7  ;;  %v3008_v7 = vld [vmem:[#allocation6 + $0x98] sm:$0xff]  }
  0xb3   : > { %2695 = vmatpush3.bf16.msra.mxu1 %v2967_v63  ;;  %2714 = vmatprep.subr.bf16.mxu0 %v2995_v8  ;;  %v3005_v63 = vld [vmem:[#allocation6 + $0x80] sm:$0xff]  }
  0xb4   : > { %2696 = vmatprep.subr.bf16.mxu1 %v2968_v1 }
  0xb6   : > { %2715 = vmatpush3.bf16.msra.mxu0 %v2995_v8  ;;  %v3009_v8 = vld [vmem:[#allocation6 + $0xa0] sm:$0xff]  }
  0xb7   : > { %2697 = vmatpush3.bf16.msra.mxu1 %v2968_v1  ;;  %2716 = vmatprep.subr.bf16.mxu0 %v2996_v11 }
  0xb8   : > { %2762 = vmatprep.subr.bf16.mxu1 %v3013_v13 }
  0xba   : > { %2699 = vmatmul.mubr.bf16.vlgmr.msra.gmra.mrb[0].mxu1 %v988_v41  ;;  %2717 = vmatpush3.bf16.msra.mxu0 %v2996_v11  ;;  %v3012_v11 = vld [vmem:[#allocation6 + $0xb8] sm:$0xff]  }
  0xbb   : > { %2722 = vmatprep.subr.bf16.mxu0 %v2997_v12  ;;  %2763 = vmatpush3.bf16.msra.mxu1 %v3013_v13  ;;  %v3018_v13 = vld [vmem:[#allocation6 + $0xe8] sm:$0xff]  }
  0xbc   : > { %2764 = vmatprep.subr.bf16.mxu1 %v3014_v14 }
  0xbf   : > { %2765 = vmatpush3.bf16.msra.mxu1 %v3014_v14  ;;  %v3019_v14 = vld [vmem:[#allocation6 + $0xf0] sm:$0xff]  }
  0xc0   : > { %2766 = vmatprep.subr.bf16.mxu1 %v3015_v15 }
  0xc3   : > { %2767 = vmatpush3.bf16.msra.mxu1 %v3015_v15  ;;  %v2426_v15 = vld [vmem:[%s3580_s5 + $0x5] ss:$0 sm:$0xff] }
  0xc4   : > { %2768 = vmatprep.subr.bf16.mxu1 %v3016_v16 }
  0xc7   : > { %2769 = vmatpush3.bf16.msra.mxu1 %v3016_v16  ;;  %v1516_v16 = vpack.c.bf16 %v2426_v15, %v2426_v15 }
  0xc9   : > { %1517 = vst [vmem:[#allocation3 + $0x8] sm:$0x80] %v1516_v16 }
 0x170   : > { %v2640_v18 = vpop.f32.mrb[0].mxu0 }
 0x171   : > { %v2862_v20 = vadd.f32 %v2640_v18, %v2327_v17  ;;  %v664_v21 = vpop.f32.mrb[1].mxu0  ;;  %v3021_v18 = vld [vmem:[#allocation6 + $0x100] sm:$0xff]  }
 0x172   : > { %v2864_v22 = vadd.f32 %v2327_v17, %v664_v21  ;;  %v2641_v23 = vpop.f32.mrb[2].mxu0  ;;  %v2425_v21 = vld [vmem:[%s3580_s5 + $0x4] ss:$0 sm:$0xff] }
 0x173   : > { %v3465_v24 = vadd.f32 %v2862_v20, %v2338_v19  ;;  %v2866_v25 = vadd.f32 %v2641_v23, %v2327_v17  ;;  %v667_v26 = vpop.f32.mrb[3].mxu0  ;;  %v3162_v20 = vmov 0.0  }
 0x174   : > { %v3470_v28 = vadd.f32 %v2864_v22, %v2338_v19  ;;  %v2868_v29 = vadd.f32 %v2327_v17, %v667_v26  ;;  %v3020_v17 = vld [vmem:[#allocation6 + $0xf8] sm:$0xff]  }
 0x175   : > { %694 = vst [vmem:[%s409_s28 + $0x10] sm:$0xff] %v3465_v24  ;;  %v3473_v30 = vadd.f32 %v2866_v25, %v2338_v19 }
 0x176   : > { %692 = vst [vmem:[%s409_s28] sm:$0xff] %v3470_v28  ;;  %v3476_v32 = vadd.f32 %v2868_v29, %v2338_v19  ;;  %v3037_v19 = vld [vmem:[%s3581_s6] sm:$0xff]  }
 0x177   : > { %695 = vst [vmem:[%s409_s28 + $0x18] sm:$0xff] %v3473_v30 }
 0x178   : > { %693 = vst [vmem:[%s409_s28 + $0x8] sm:$0xff] %v3476_v32 }
 0x18d   : > { %v2700_v31 = vpop.f32.mrb[0].mxu1 }
 0x18e   : > { %v1100_v33 = vadd.f32 %v2700_v31, %v2399_v27  ;;  %v1074_v34 = vpop.f32.mrb[1].mxu1 }
 0x18f   : > { %v1098_v35 = vadd.f32 %v2399_v27, %v1074_v34  ;;  %v2701_v36 = vpop.f32.mrb[2].mxu1 }
 0x190   : > { %v1101_v37 = vadd.f32 %v2701_v36, %v2399_v27  ;;  %v1077_v38 = vpop.f32.mrb[3].mxu1  ;;  %v1104_v40 = vmax.f32 %v1100_v33, 0.0 }
 0x191   : > { %v1099_v39 = vadd.f32 %v2399_v27, %v1077_v38  ;;  %v1102_v42 = vmax.f32 %v1098_v35, 0.0 }
 0x192   : > { %v1105_v41 = vmax.f32 %v1101_v37, 0.0 }
 0x193   : > { %v1103_v43 = vmax.f32 %v1099_v39, 0.0 }
 0x194   : > { %v1107_v44 = vpack.c.bf16 %v1105_v41, %v1104_v40 }
 0x195   : > { %v1106_v45 = vpack.c.bf16 %v1103_v43, %v1102_v42  ;;  %v3022_v42 = vld [vmem:[#allocation6 + $0x108] sm:$0xff]  }
 0x196   : > { %1109 = vst [vmem:[#allocation2 + $0x8] sm:$0x7f] %v1107_v44 }
 0x197   : > { %1108 = vst [vmem:[#allocation2] sm:$0xff] %v1106_v45  ;;  %2718 = vmatprep.mubr.bf16.mxu0 %v1106_v45  ;;  %v1253_v46 = vshll.u32 %v1106_v45, 16  ;;  %v1251_v51 = vshrl.u32 %v1106_v45, 16 }
 0x199   : > { %v1255_v47 = vrot.slane %v1253_v46, 1 }
 0x19b   : > { %v1256_v53 = vor.u32 %v1255_v47, %v1251_v51  ;;  %v3024_v51 = vld [vmem:[#allocation6 + $0x118] sm:$0xff]  }
 0x19d   : > { %v1118_v49 = vld [vmem:[#allocation2 + $0x8] sm:$0x7f] }
 0x19e   : > { %v1232_v50 = vld [vmem:[#allocation2 + $0x8] sm:$0xff]  ;;  %2719 = vmatmul.mubr.bf16.vlgmr.msra.gmra.mrb[4].mxu0 %v1118_v49  ;;  %v1368_v62 = vld [vmem:[#allocation2] sm:$0xfe]  ;;  %v3023_v49 = vld [vmem:[#allocation6 + $0x110] sm:$0xff]  }
 0x19f   : > { %v1258_v52 = vshll.u32 %v1232_v50, 16  ;;  %2723 = vmatpush3.bf16.msra.mxu0 %v2997_v12  ;;  %v1262_v0 = vshrl.u32 %v1232_v50, 16  ;;  %v1388_v1 = vrot.slane %v1368_v62, 1  ;;  %v1389_v2 = vrot.slane %v1232_v50, 1  ;;  %v3017_v12 = vld [vmem:[#allocation6 + $0xe0] sm:$0xff]   ;;  %v3030_v62 = vld [vmem:[#allocation6 + $0x148] sm:$0xff]  }
 0x1a0   : > { %2724 = vmatprep.subr.bf16.mxu0 %v2998_v48  ;;  %2770 = vmatprep.subr.bf16.mxu1 %v3017_v12 }
 0x1a1   : > { %v1260_v54 = vrot.slane %v1258_v52, 1  ;;  %v1390_v5 = vsel %vm986_vm1, %v1388_v1, %v1389_v2  ;;  %2771 = vmatpush3.bf16.msra.mxu1 %v3017_v12  ;;  %v3025_v52 = vld [vmem:[#allocation6 + $0x120] sm:$0xff]   ;;  %v3032_v1 = vld [vmem:[#allocation6 + $0x158] sm:$0xff]  }
 0x1a2   : > { %2772 = vmatprep.subr.bf16.mxu1 %v3018_v13  ;;  %v3044_v12 = vld [vmem:[%s3581_s6 + $0x38] sm:$0xff]  }
 0x1a3   : > { %v1261_v56 = vsel %vm846_vm0, %v1256_v53, %v1260_v54  ;;  %2725 = vmatpush3.bf16.msra.mxu0 %v2998_v48  ;;  %v1264_v3 = vor.u32 %v1262_v0, %v1260_v54  ;;  %v3026_v53 = vld [vmem:[#allocation6 + $0x128] sm:$0xff]   ;;  %v3027_v54 = vld [vmem:[#allocation6 + $0x130] sm:$0xff]  }
 0x1a4   : > { %2738 = vmatprep.mubr.bf16.mxu0 %v1261_v56  ;;  %2726 = vmatprep.subr.bf16.mxu0 %v2999_v55  ;;  %v3031_v0 = vld [vmem:[#allocation6 + $0x150] sm:$0xff]  }
 0x1a5   : > { %2773 = vmatpush3.bf16.msra.mxu1 %v3018_v13 }
 0x1a6   : > { %2774 = vmatprep.subr.bf16.mxu1 %v3019_v14 }
 0x1a7   : > { %2727 = vmatpush3.bf16.msra.mxu0 %v2999_v55  ;;  %v3028_v55 = vld [vmem:[#allocation6 + $0x138] sm:$0xff]  }
 0x1a8   : > { %2728 = vmatprep.subr.bf16.mxu0 %v3000_v57 }
 0x1a9   : > { %2775 = vmatpush3.bf16.msra.mxu1 %v3019_v14  ;;  %v2451_v14 = vld [vmem:[%s3580_s5 + $0x6] ss:$0 sm:$0xff] }
 0x1aa   : > { %2776 = vmatprep.subr.bf16.mxu1 %v3020_v17 }
 0x1ab   : > { %2729 = vmatpush3.bf16.msra.mxu0 %v3000_v57  ;;  %v3029_v57 = vld [vmem:[#allocation6 + $0x140] sm:$0xff]  }
 0x1ac   : > { %2730 = vmatprep.subr.bf16.mxu0 %v3001_v58 }
 0x1ad   : > { %2777 = vmatpush3.bf16.msra.mxu1 %v3020_v17 }
 0x1ae   : > { %2782 = vmatprep.subr.bf16.mxu1 %v3021_v18 }
 0x1af   : > { %2731 = vmatpush3.bf16.msra.mxu0 %v3001_v58 }
 0x1b0   : > { %2732 = vmatprep.subr.bf16.mxu0 %v3002_v59 }
 0x1b3   : > { %2733 = vmatpush3.bf16.msra.mxu0 %v3002_v59 }
 0x1b4   : > { %2734 = vmatprep.subr.bf16.mxu0 %v3003_v60 }
 0x1b7   : > { %2735 = vmatpush3.bf16.msra.mxu0 %v3003_v60 }
 0x1b8   : > { %2736 = vmatprep.subr.bf16.mxu0 %v3004_v61 }
 0x1bb   : > { %2737 = vmatpush3.bf16.msra.mxu0 %v3004_v61 }
 0x1bc   : > { %2742 = vmatprep.subr.bf16.mxu0 %v3005_v63 }
 0x1be   : > { %2739 = vmatmul.mubr.bf16.vlgmr.msra.gmra.mrb[4].mxu0 %v1264_v3  ;;  %v3034_v3 = vld [vmem:[#allocation6 + $0x168] sm:$0xff]  }
 0x1bf   : > { %2743 = vmatpush3.bf16.msra.mxu0 %v3005_v63  ;;  %2758 = vmatprep.mubr.bf16.mxu0 %v1390_v5  ;;  %v3036_v5 = vld [vmem:[#allocation6 + $0x178] sm:$0xff]  }
 0x1c0   : > { %2744 = vmatprep.subr.bf16.mxu0 %v3006_v4 }
 0x1c3   : > { %2745 = vmatpush3.bf16.msra.mxu0 %v3006_v4  ;;  %v3035_v4 = vld [vmem:[#allocation6 + $0x170] sm:$0xff]  }
 0x1c4   : > { %2746 = vmatprep.subr.bf16.mxu0 %v3007_v6 }
 0x1c7   : > { %2747 = vmatpush3.bf16.msra.mxu0 %v3007_v6  ;;  %v3038_v6 = vld [vmem:[%s3581_s6 + $0x8] sm:$0xff]  }
 0x1c8   : > { %2748 = vmatprep.subr.bf16.mxu0 %v3008_v7 }
 0x1cb   : > { %2749 = vmatpush3.bf16.msra.mxu0 %v3008_v7  ;;  %v3039_v7 = vld [vmem:[%s3581_s6 + $0x10] sm:$0xff]  }
 0x1cc   : > { %2750 = vmatprep.subr.bf16.mxu0 %v3009_v8 }
 0x1cf   : > { %2751 = vmatpush3.bf16.msra.mxu0 %v3009_v8  ;;  %v3040_v8 = vld [vmem:[%s3581_s6 + $0x18] sm:$0xff]  }
 0x1d0   : > { %2752 = vmatprep.subr.bf16.mxu0 %v3010_v9 }
 0x1d3   : > { %2753 = vmatpush3.bf16.msra.mxu0 %v3010_v9  ;;  %v3041_v9 = vld [vmem:[%s3581_s6 + $0x20] sm:$0xff]  }
 0x1d4   : > { %2754 = vmatprep.subr.bf16.mxu0 %v3011_v10 }
 0x1d7   : > { %2755 = vmatpush3.bf16.msra.mxu0 %v3011_v10  ;;  %v3042_v10 = vld [vmem:[%s3581_s6 + $0x28] sm:$0xff]  }
 0x1d8   : > { %2756 = vmatprep.subr.bf16.mxu0 %v3012_v11 }
 0x1db   : > { %2757 = vmatpush3.bf16.msra.mxu0 %v3012_v11  ;;  %v3043_v11 = vld [vmem:[%s3581_s6 + $0x30] sm:$0xff]  }
 0x1dc   : > { %2822 = vmatprep.subr.bf16.mxu0 %v3162_v20 }
 0x1de   : > { %2759 = vmatmul.mubr.bf16.vlgmr.msra.gmra.mrb[4].mxu0 %v1389_v2  ;;  %v3033_v2 = vld [vmem:[#allocation6 + $0x160] sm:$0xff]  }
 0x1df   : > { %2823 = vmatpush3.bf16.msra.mxu0 %v3037_v19  ;;  %2838 = vmatprep.mubr.msk.bf16.mxu0 %vm3163_vm2, %v3162_v20 }
 0x1e0   : > { %2824 = vmatprep.subr.bf16.mxu0 %v3162_v20 }
 0x1e3   : > { %2825 = vmatpush3.bf16.msra.mxu0 %v3038_v6 }
 0x1e4   : > { %2826 = vmatprep.subr.bf16.mxu0 %v3162_v20 }
 0x1e7   : > { %2827 = vmatpush3.bf16.msra.mxu0 %v3039_v7 }
 0x1e8   : > { %2828 = vmatprep.subr.bf16.mxu0 %v3162_v20 }
 0x1eb   : > { %2829 = vmatpush3.bf16.msra.mxu0 %v3040_v8 }
 0x1ec   : > { %2830 = vmatprep.subr.bf16.mxu0 %v3162_v20 }
 0x1ef   : > { %2831 = vmatpush3.bf16.msra.mxu0 %v3041_v9 }
 0x1f0   : > { %2832 = vmatprep.subr.bf16.mxu0 %v3162_v20 }
 0x1f3   : > { %2833 = vmatpush3.bf16.msra.mxu0 %v3042_v10 }
 0x1f4   : > { %2834 = vmatprep.subr.bf16.mxu0 %v3162_v20 }
 0x1f7   : > { %2835 = vmatpush3.bf16.msra.mxu0 %v3043_v11 }
 0x1f8   : > { %2836 = vmatprep.subr.bf16.mxu0 %v3162_v20 }
 0x1fb   : > { %2837 = vmatpush3.bf16.msra.mxu0 %v3044_v12 }
 0x1fc   : > { %2842 = vmatprep.subr.bf16.mxu0 %v3162_v20 }
 0x2b1   : > { %v2760_v22 = vpop.f32.mrb[4].mxu0 }
 0x2b2   : > { %v1501_v23 = vadd.f32 %v2760_v22, %v2425_v21  ;;  %v1475_v25 = vpop.f32.mrb[5].mxu0 }
 0x2b3   : > { %v1499_v26 = vadd.f32 %v2425_v21, %v1475_v25  ;;  %v2761_v27 = vpop.f32.mrb[6].mxu0 }
 0x2b4   : > { %v1502_v29 = vadd.f32 %v2761_v27, %v2425_v21  ;;  %v1478_v31 = vpop.f32.mrb[7].mxu0  ;;  %v1505_v34 = vmax.f32 %v1501_v23, 0.0 }
 0x2b5   : > { %v1500_v33 = vadd.f32 %v2425_v21, %v1478_v31  ;;  %v1503_v36 = vmax.f32 %v1499_v26, 0.0 }
 0x2b6   : > { %v1506_v35 = vmax.f32 %v1502_v29, 0.0 }
 0x2b7   : > { %v1504_v37 = vmax.f32 %v1500_v33, 0.0 }
 0x2b8   : > { %v1508_v38 = vpack.c.bf16 %v1506_v35, %v1505_v34  ;;  %v1905_v34 = vld [vmem:[%s3580_s5 + $0x7] sm:$0x1] }
 0x2b9   : > { %v1507_v39 = vpack.c.bf16 %v1504_v37, %v1503_v36  ;;  %v1917_v37 = vmul.f32 2.0, %v1905_v34 }
 0x2ba   : > { %1510 = vst [vmem:[#allocation3 + $0x8] sm:$0x7f] %v1508_v38 }
 0x2bb   : > { %1509 = vst [vmem:[#allocation3] sm:$0xff] %v1507_v39  ;;  %2778 = vmatprep.mubr.bf16.mxu1 %v1507_v39  ;;  %v1655_v40 = vshll.u32 %v1507_v39, 16  ;;  %v1653_v45 = vshrl.u32 %v1507_v39, 16 }
 0x2bd   : > { %v1657_v41 = vrot.slane %v1655_v40, 1 }
 0x2bf   : > { %v1658_v47 = vor.u32 %v1657_v41, %v1653_v45  ;;  %v3045_v41 = vld [vmem:[#allocation8] sm:$0xff]   ;;  %v3048_v45 = vld [vmem:[#allocation8 + $0x18] sm:$0xff]  }
 0x2c1   : > { %v1519_v43 = vld [vmem:[#allocation3 + $0x8] sm:$0x7f] }
 0x2c2   : > { %v1634_v44 = vld [vmem:[#allocation3 + $0x8] sm:$0xff]  ;;  %2779 = vmatmul.mubr.bf16.vlgmr.msra.gmra.mrb[4].mxu1 %v1519_v43  ;;  %v1770_v56 = vld [vmem:[#allocation3] sm:$0xfe]  ;;  %v3046_v43 = vld [vmem:[#allocation8 + $0x8] sm:$0xff]  }
 0x2c3   : > { %v1660_v46 = vshll.u32 %v1634_v44, 16  ;;  %2783 = vmatpush3.bf16.msra.mxu1 %v3021_v18  ;;  %v1664_v58 = vshrl.u32 %v1634_v44, 16  ;;  %v1790_v59 = vrot.slane %v1770_v56, 1  ;;  %v1791_v60 = vrot.slane %v1634_v44, 1  ;;  %v3047_v44 = vld [vmem:[#allocation8 + $0x10] sm:$0xff]  }
 0x2c4   : > { %2784 = vmatprep.subr.bf16.mxu1 %v3022_v42 }
 0x2c5   : > { %v1662_v48 = vrot.slane %v1660_v46, 1  ;;  %v1792_v63 = vsel %vm986_vm1, %v1790_v59, %v1791_v60  ;;  %v3049_v46 = vld [vmem:[#allocation8 + $0x20] sm:$0xff]  }
 0x2c7   : > { %v1663_v50 = vsel %vm846_vm0, %v1658_v47, %v1662_v48  ;;  %2785 = vmatpush3.bf16.msra.mxu1 %v3022_v42  ;;  %v1666_v61 = vor.u32 %v1664_v58, %v1662_v48  ;;  %v3050_v47 = vld [vmem:[#allocation8 + $0x28] sm:$0xff]   ;;  %v3051_v48 = vld [vmem:[#allocation8 + $0x30] sm:$0xff]  }
 0x2c8   : > { %2798 = vmatprep.mubr.bf16.mxu1 %v1663_v50  ;;  %2786 = vmatprep.subr.bf16.mxu1 %v3023_v49  ;;  %v1920_v50 = vld [vmem:[%s3580_s5 + $0x9] sm:$0x1]  ;;  %v2027_v58 = vld [vmem:[%s3580_s5 + $0x8] sm:$0x1] }
 0x2cb   : > { %2787 = vmatpush3.bf16.msra.mxu1 %v3023_v49  ;;  %v3052_v49 = vld [vmem:[#allocation8 + $0x38] sm:$0xff]  }
 0x2cc   : > { %2788 = vmatprep.subr.bf16.mxu1 %v3024_v51 }
 0x2cf   : > { %2789 = vmatpush3.bf16.msra.mxu1 %v3024_v51 }
 0x2d0   : > { %2790 = vmatprep.subr.bf16.mxu1 %v3025_v52 }
 0x2d3   : > { %2791 = vmatpush3.bf16.msra.mxu1 %v3025_v52 }
 0x2d4   : > { %2792 = vmatprep.subr.bf16.mxu1 %v3026_v53 }
 0x2d7   : > { %2793 = vmatpush3.bf16.msra.mxu1 %v3026_v53 }
 0x2d8   : > { %2794 = vmatprep.subr.bf16.mxu1 %v3027_v54 }
 0x2db   : > { %2795 = vmatpush3.bf16.msra.mxu1 %v3027_v54 }
 0x2dc   : > { %2796 = vmatprep.subr.bf16.mxu1 %v3028_v55 }
 0x2df   : > { %2797 = vmatpush3.bf16.msra.mxu1 %v3028_v55 }
 0x2e0   : > { %2802 = vmatprep.subr.bf16.mxu1 %v3029_v57 }
 0x2e2   : > { %2799 = vmatmul.mubr.bf16.vlgmr.msra.gmra.mrb[4].mxu1 %v1666_v61 }
 0x2e3   : > { %2803 = vmatpush3.bf16.msra.mxu1 %v3029_v57  ;;  %2818 = vmatprep.mubr.bf16.mxu1 %v1792_v63 }
 0x2e4   : > { %2804 = vmatprep.subr.bf16.mxu1 %v3030_v62 }
 0x2e7   : > { %2805 = vmatpush3.bf16.msra.mxu1 %v3030_v62 }
 0x2e8   : > { %2806 = vmatprep.subr.bf16.mxu1 %v3031_v0 }
 0x2eb   : > { %2807 = vmatpush3.bf16.msra.mxu1 %v3031_v0 }
 0x2ec   : > { %2808 = vmatprep.subr.bf16.mxu1 %v3032_v1 }
 0x2ef   : > { %2809 = vmatpush3.bf16.msra.mxu1 %v3032_v1 }
 0x2f0   : > { %2810 = vmatprep.subr.bf16.mxu1 %v3033_v2 }
 0x2f3   : > { %2811 = vmatpush3.bf16.msra.mxu1 %v3033_v2 }
 0x2f4   : > { %2812 = vmatprep.subr.bf16.mxu1 %v3034_v3 }
 0x2f7   : > { %2813 = vmatpush3.bf16.msra.mxu1 %v3034_v3  ;;  %v2139_v3 = vlaneseq }
 0x2f8   : > { %2814 = vmatprep.subr.bf16.mxu1 %v3035_v4 }
 0x2fb   : > { %2815 = vmatpush3.bf16.msra.mxu1 %v3035_v4  ;;  %v2140_v4 = vshrl.u32 %v2139_v3, 7 }
 0x2fc   : > { %2816 = vmatprep.subr.bf16.mxu1 %v3036_v5 }
 0x2ff   : > { %2817 = vmatpush3.bf16.msra.mxu1 %v3036_v5  ;;  %v2141_v5 = vsub.s32 0, %v2140_v4 }
 0x302   : > { %2819 = vmatmul.mubr.bf16.vlgmr.msra.gmra.mrb[4].mxu1 %v1791_v60 }
 0x3d5   : > { %v2820_v13 = vpop.f32.mrb[4].mxu1 }
 0x3d6   : > { %v1877_v15 = vpop.f32.mrb[5].mxu1  ;;  %v3534_v22 = vadd.f32 %v2820_v13, %v2451_v14 }
 0x3d7   : > { %v2821_v16 = vpop.f32.mrb[6].mxu1  ;;  %v3528_v18 = vadd.f32 %v2451_v14, %v1877_v15 }
 0x3d8   : > { %v1880_v17 = vpop.f32.mrb[7].mxu1  ;;  %v3532_v21 = vadd.f32 %v2821_v16, %v2451_v14 }
 0x3d9   : > { %v3530_v19 = vadd.f32 %v2451_v14, %v1880_v17 }
 0x3da   : > { %v1909_v26 = vsel %vm1908_vm3, %v3532_v21, 0.0 }
 0x3db   : > { %v1906_v23 = vadd.f32 %v3530_v19, %v3528_v18 }
 0x3dd   : > { %v1907_v25 = vadd.f32 %v1906_v23, %v3534_v22 }
 0x3df   : > { %v1910_v27 = vadd.f32 %v1909_v26, %v1907_v25 }
 0x3e1   : > { %v1911_v29 = vrot.slane %v1910_v27, 4 }
 0x3e3   : > { %v1912_v31 = vadd.f32 %v1911_v29, %v1910_v27 }
 0x3e5   : > { %v1913_v33 = vrot.slane %v1912_v31, 2 }
 0x3e7   : > { %v1914_v35 = vadd.f32 %v1913_v33, %v1912_v31 }
 0x3e9   : > { %v1915_v36 = vrot.slane %v1914_v35, 1 }
 0x3eb   : > { %v1916_v38 = vadd.f32 %v1915_v36, %v1914_v35 }
 0x3ed   : > { %v1918_v39 = vadd.f32 %v1917_v37, %v1916_v38 }
 0x3ef   : > { %v1919_v40 = vmul.f32 0.03125, %v1918_v39 }
 0x3f1   : > { %v1921_v42 = vpack.c.bf16 %v1919_v40, %v1919_v40 }
 0x3f3   : > { %2839 = vmatmul.mubr.bf16.vlgmr.msra.gmra.mrb[8].mxu0 %v1921_v42 }
 0x3f4   : > { %2843 = vmatpush3.bf16.msra.mxu0 %v3045_v41  ;;  %2858 = vmatprep.mubr.msk.bf16.mxu0 %vm3163_vm2, %v3162_v20 }
 0x3f5   : > { %2844 = vmatprep.subr.bf16.mxu0 %v3162_v20 }
 0x3f8   : > { %2845 = vmatpush3.bf16.msra.mxu0 %v3046_v43 }
 0x3f9   : > { %2846 = vmatprep.subr.bf16.mxu0 %v3162_v20 }
 0x3fc   : > { %2847 = vmatpush3.bf16.msra.mxu0 %v3047_v44 }
 0x3fd   : > { %2848 = vmatprep.subr.bf16.mxu0 %v3162_v20 }
 0x400   : > { %2849 = vmatpush3.bf16.msra.mxu0 %v3048_v45 }
 0x401   : > { %2850 = vmatprep.subr.bf16.mxu0 %v3162_v20 }
 0x404   : > { %2851 = vmatpush3.bf16.msra.mxu0 %v3049_v46 }
 0x405   : > { %2852 = vmatprep.subr.bf16.mxu0 %v3162_v20 }
 0x408   : > { %2853 = vmatpush3.bf16.msra.mxu0 %v3050_v47 }
 0x409   : > { %2854 = vmatprep.subr.bf16.mxu0 %v3162_v20 }
 0x40c   : > { %2855 = vmatpush3.bf16.msra.mxu0 %v3051_v48 }
 0x40d   : > { %2856 = vmatprep.subr.bf16.mxu0 %v3162_v20 }
 0x410   : > { %2857 = vmatpush3.bf16.msra.mxu0 %v3052_v49 }
 0x4c6   : > { %v2020_v51 = vpop.f32.mrb[8].mxu0 }
 0x4c7   : > { %v2021_v52 = vadd.f32 %v2020_v51, %v1920_v50  ;;  %v2840_v53 = vpop.f32.mrb[9].mxu0 }
 0x4c8   : > { %v2023_v54 = vpop.f32.mrb[10].mxu0 }
 0x4c9   : > { %v2026_v55 = vmax.f32 %v2021_v52, 0.0  ;;  %v2841_v56 = vpop.f32.mrb[11].mxu0 }
 0x4cb   : > { %v2028_v57 = vpack.c.bf16 %v2026_v55, %v2026_v55 }
 0x4cd   : > { %2859 = vmatmul.mubr.bf16.vlgmr.msra.gmra.mrb[12].mxu0 %v2028_v57 }
 0x5a0   : > { %v2127_v59 = vpop.f32.mrb[12].mxu0 }
 0x5a1   : > { %v2128_v20 = vadd.f32 %v2127_v59, %v2027_v58  ;;  %v2860_v60 = vpop.f32.mrb[13].mxu0 }
 0x5a2   : > { %v2130_v61 = vpop.f32.mrb[14].mxu0 }
 0x5a3   : > { %v2133_v62 = vsub.f32 0.0, %v2128_v20  ;;  %v2861_v63 = vpop.f32.mrb[15].mxu0 }
 0x5a5   : > { %v2134_v0 = vmul.f32 1.442695, %v2133_v62 }
 0x5a7   : > { %3053 = vpow2.f32 %v2134_v0 }
 0x5b1   : > { %v3054_v1 = vpop.eup %3053 }
 0x5b2   : > { %v2136_v2 = vadd.f32 1.0, %v3054_v1 }
 0x5b4   : > { %3055 = vrcp.f32 %v2136_v2 }
 0x5be   : > { %v3056_v6 = vpop.eup %3055 }
 0x5bf   : > { %v2142_v7 = vrot.slane %v3056_v6, %v2141_v5  ;;  %v2159_v8 = vmul.f32 %v3056_v6, %v1905_v34 }
 0x5c1   : > { %v2143_v9 = vmul.f32 %v2142_v7, %v3528_v18  ;;  %v2144_v10 = vmul.f32 %v2142_v7, %v3530_v19  ;;  %v2145_v11 = vmul.f32 %v2142_v7, %v3534_v22  ;;  %v2146_v12 = vmul.f32 %v2142_v7, %v3532_v21 }
 0x5c2   : > { %v2163_v13 = vrot.slane %v2159_v8, %v2141_v5 }
 0x5c3   : > { %v2147_v14 = vadd.f32 %v3470_v28, %v2143_v9  ;;  %v2148_v15 = vadd.f32 %v3476_v32, %v2144_v10  ;;  %v2149_v16 = vadd.f32 %v3465_v24, %v2145_v11  ;;  %v2150_v17 = vadd.f32 %v3473_v30, %v2146_v12 }
 0x5c4   : > { %v2164_v18 = vadd.f32 %v3473_v30, %v2163_v13 }
 0x5c5   : > { %v2151_v19 = vmax.f32 %v2147_v14, 0.0  ;;  %v2152_v22 = vmax.f32 %v2148_v15, 0.0  ;;  %v2153_v23 = vmax.f32 %v2149_v16, 0.0  ;;  %v2154_v21 = vmax.f32 %v2150_v17, 0.0 }
 0x5c6   : > { %v2165_v25 = vmax.f32 %v2164_v18, 0.0 }
 0x5c7   : > { %2155 = vst [vmem:[%s404_s13] sm:$0xff] %v2151_v19  ;;  %2156 = vst [vmem:[%s404_s13 + $0x8] sm:$0xff] %v2152_v22 }
 0x5c8   : > { %2157 = vst [vmem:[%s404_s13 + $0x10] sm:$0xff] %v2153_v23  ;;  %2158 = vst [vmem:[%s404_s13 + $0x18] sm:$0x3f] %v2154_v21 }
 0x5c9   : > { %2166 = vst [vmem:[%s404_s13 + $0x18] sm:$0xc0] %v2165_v25 }
 0x5ca PF: > { %s22_s30 = sadd.s32 1, %s3155_s30  }
 0x5cb   : > { %p19_p5 = scmp.ge.s32.totalorder %s22_s30, 4  }
 0x5cd   :  { %21 = sbr.rel (!%p19_p5) target bundleno = 2 (0x2), region = 118 }
 0x5d4   :  { %2204 = vsyncpa [#allocation5], 1 }
 0x5d5   :  { %2206 = vsyncpa [#allocation5 + $0x1], 1 }
 0x5d6   :  { %2207 = vsyncpa [#allocation7], 1 }

</bundles_post_ra>
